<compile_context>
chip_gen: v6e
topology: v6e:2x2x1
jax: 0.10.0
libtpu: 0.0.40
codegen_flags: <defaults>
</compile_context>

<pallas_src>
import jax
import jax.numpy as jnp
from jax.experimental import pallas as pl
from jax.experimental.pallas import tpu as pltpu

F = 128          # node feature width (fixed by Conv1d(128, 128, ...))
N_CLASSES = 5    # arg.num_labels
PAD = 3          # shared zero padding = max dilation
EPS = 1e-5


def _vmem():
    return pl.BlockSpec(memory_space=pltpu.MemorySpace.VMEM)


def _batchnorm(t):
    # BatchNorm1d over the node/batch axis, per channel, biased variance.
    mean = jnp.mean(t, axis=0, keepdims=True)
    var = jnp.mean((t - mean) ** 2, axis=0, keepdims=True)
    return (t - mean) * jax.lax.rsqrt(var + EPS)


# ---------------------------------------------------------------------------
# Single fused kernel: 3 dilated convs -> 3 conv_bn blocks -> gconv11/12/13
# (+relu) -> pressConv+bn -> gconv2/3/4(+relu) -> sum readouts -> classify1
# -> classify2.
# ---------------------------------------------------------------------------
def make_fused_kernel(n):
    def kernel(xpad_ref, adj_ref, conv_w_ref, conv_b_ref,
               g1_w_ref, g1_b_ref, press_B_ref, press_b_ref,
               gh_w_ref, gh_b_ref, c1_w_ref, c1_b_ref,
               c2_w_ref, c2_b_ref, out_ref):
        adj = adj_ref[...]                                   # [n, n] f32
        x_center = xpad_ref[PAD:PAD + n, :]                  # shared center tap

        # ----- stage 1: each dilated Conv1d computed once, one K=384 matmul
        def dilated_conv(d):
            xc = jnp.concatenate(
                [xpad_ref[PAD - d:PAD - d + n, :],           # tap k=0 (offset -d)
                 x_center,                                   # tap k=1
                 xpad_ref[PAD + d:PAD + d + n, :]],          # tap k=2 (offset +d)
                axis=1)                                      # [n, 3F] f32
            acc = jnp.dot(xc.astype(jnp.bfloat16), conv_w_ref[d - 1],
                          preferred_element_type=jnp.float32)
            return acc + conv_b_ref[d - 1:d, :]              # [n, F] f32

        c1 = dilated_conv(1)
        c2 = dilated_conv(2)
        c3 = dilated_conv(3)

        # conv1D(convX=1/2/3) = batchnorm(relu(a) + b), pairs (1,2),(2,3),(3,1),
        # kept lane-concatenated so BatchNorm (per-channel) runs once on [n,3F].
        pre_cat = jnp.concatenate([jnp.maximum(c1, 0.0) + c2,
                                   jnp.maximum(c2, 0.0) + c3,
                                   jnp.maximum(c3, 0.0) + c1], axis=1)
        h_cat = _batchnorm(pre_cat)                          # [n, 3F]

        # ----- first GraphConv stage: ONE adj matmul over the concat, then
        # three lane-aligned [F,F] weight matmuls; bias + relu applied once.
        ax_cat = jnp.dot(adj, h_cat, preferred_element_type=jnp.float32)
        axb = ax_cat.astype(jnp.bfloat16)
        hw_cat = jnp.concatenate(
            [jnp.dot(axb[:, 0:F], g1_w_ref[0],
                     preferred_element_type=jnp.float32),
             jnp.dot(axb[:, F:2 * F], g1_w_ref[1],
                     preferred_element_type=jnp.float32),
             jnp.dot(axb[:, 2 * F:3 * F], g1_w_ref[2],
                     preferred_element_type=jnp.float32)], axis=1)
        ac_cat = jnp.maximum(hw_cat + g1_b_ref[...], 0.0)    # [n, 3F]

        # ----- pressConv as one banded [n,3F]x[3F,F] matmul, then BatchNorm.
        pressed = jnp.dot(ac_cat.astype(jnp.bfloat16), press_B_ref[...],
                          preferred_element_type=jnp.float32) + press_b_ref[...]
        ac_h1 = _batchnorm(pressed)
        # dropout(p=0.2) -> identity (inference)

        # ----- gconv2 -> gconv3 -> gconv4 (each + relu), serial chain
        def gconv_relu(x, w_bf16, b):
            ax = jnp.dot(adj, x, preferred_element_type=jnp.float32)   # K=n, f32
            h = jnp.dot(ax.astype(jnp.bfloat16), w_bf16,
                        preferred_element_type=jnp.float32) + b
            return jnp.maximum(h, 0.0)

        ac2 = gconv_relu(ac_h1, gh_w_ref[0], gh_b_ref[0:1, :])
        ac3 = gconv_relu(ac2, gh_w_ref[1], gh_b_ref[1:2, :])
        ac4 = gconv_relu(ac3, gh_w_ref[2], gh_b_ref[2:3, :])

        # ----- sum readouts, classify1 (384->128), classify2 (128->5 padded)
        hg = jnp.sum(jnp.concatenate([ac2, ac3, ac4], axis=1),
                     axis=0, keepdims=True)                           # [1, 3F]
        # Broadcast to 8 sublane-native rows (row 0 is the real readout).
        hg8 = jnp.broadcast_to(hg, (8, 3 * F)).astype(jnp.bfloat16)
        hidden = jnp.dot(hg8, c1_w_ref[...],
                         preferred_element_type=jnp.float32) + c1_b_ref[...]
        out_ref[...] = jnp.dot(hidden.astype(jnp.bfloat16), c2_w_ref[...],
                               preferred_element_type=jnp.float32) + c2_b_ref[...]

    return kernel


# ---------------------------------------------------------------------------
# Parameter setup (deterministic, synthetic).  Conv1d weights are stored as
# [tap, in, out]; Linear weights as [in, out]; pressConv weight as [in_ch, tap].
# ---------------------------------------------------------------------------
def init_params(key):
    ks = jax.random.split(key, 24)

    def w(k, shape, scale=0.05):
        return scale * jax.random.normal(k, shape, jnp.float32)

    return dict(
        conv1_w=w(ks[0], (3, F, F)), conv1_b=w(ks[1], (1, F)),
        conv2_w=w(ks[2], (3, F, F)), conv2_b=w(ks[3], (1, F)),
        conv3_w=w(ks[4], (3, F, F)), conv3_b=w(ks[5], (1, F)),
        g11_w=w(ks[6], (F, F)), g11_b=w(ks[7], (1, F)),
        g12_w=w(ks[8], (F, F)), g12_b=w(ks[9], (1, F)),
        g13_w=w(ks[10], (F, F)), g13_b=w(ks[11], (1, F)),
        press_w=w(ks[12], (3, 3)), press_b=w(ks[13], (1,)),
        g2_w=w(ks[14], (F, F)), g2_b=w(ks[15], (1, F)),
        g3_w=w(ks[16], (F, F)), g3_b=w(ks[17], (1, F)),
        g4_w=w(ks[18], (F, F)), g4_b=w(ks[19], (1, F)),
        c1_w=w(ks[20], (3 * F, F)), c1_b=w(ks[21], (1, F)),
        c2_w=w(ks[22], (F, N_CLASSES)), c2_b=w(ks[23], (1, N_CLASSES)),
    )


def pack_params(p):
    """Build kernel operands: tap-stacked bf16 conv weights, banded pressConv
    matrix, lane-padded classify2, grouped graph-conv weights/biases."""
    bf = jnp.bfloat16

    # Dilated convs: [tap, in, out] -> stacked [3F, F] per dilation; stack the
    # three convs into one [3, 3F, F] operand.
    conv_w = jnp.stack([p['conv1_w'].reshape(3 * F, F),
                        p['conv2_w'].reshape(3 * F, F),
                        p['conv3_w'].reshape(3 * F, F)], axis=0).astype(bf)
    conv_b = jnp.concatenate([p['conv1_b'], p['conv2_b'], p['conv3_b']], axis=0)

    g1_w = jnp.stack([p['g11_w'], p['g12_w'], p['g13_w']], axis=0).astype(bf)
    g1_b = jnp.concatenate([p['g11_b'], p['g12_b'], p['g13_b']], axis=1)  # [1,3F]
    gh_w = jnp.stack([p['g2_w'], p['g3_w'], p['g4_w']], axis=0).astype(bf)
    gh_b = jnp.concatenate([p['g2_b'], p['g3_b'], p['g4_b']], axis=0)

    # pressConv as banded matrices: out[:, l] = b + sum_c sum_k w[c,k]*h_c[:, l+k-1]
    # => out = sum_c h_c @ B_c + b  with  B_c[m, l] = w[c, m-l+1] for |m-l|<=1.
    idx = jnp.arange(F)
    diff = idx[:, None] - idx[None, :]                       # m - l
    bands = [sum(p['press_w'][c, k] * (diff == (k - 1)).astype(jnp.float32)
                 for k in range(3)) for c in range(3)]
    press_B = jnp.concatenate(bands, axis=0).astype(bf)      # [3F, F]
    press_b = jnp.full((1, F), p['press_b'][0], jnp.float32)

    # classify2 zero-padded to 128 lanes for a lane-dense kernel output.
    c2_w = jnp.zeros((F, F), jnp.float32).at[:, :N_CLASSES].set(p['c2_w']).astype(bf)
    c2_b = jnp.zeros((1, F), jnp.float32).at[:, :N_CLASSES].set(p['c2_b'])

    return dict(conv_w=conv_w, conv_b=conv_b,
                g1_w=g1_w, g1_b=g1_b,
                press_B=press_B, press_b=press_b,
                gh_w=gh_w, gh_b=gh_b,
                c1_w=p['c1_w'].astype(bf), c1_b=p['c1_b'],
                c2_w=c2_w, c2_b=c2_b)


# ---------------------------------------------------------------------------
# Full forward pass: one pallas_call, everything resident in VMEM.
# ---------------------------------------------------------------------------
@jax.jit
def eq_classifier_forward(h, adj, kp):
    n = h.shape[0]
    rows = ((n + 2 * PAD + 7) // 8) * 8                      # sublane-align pad
    xpad = jnp.zeros((rows, F), jnp.float32).at[PAD:PAD + n, :].set(
        h.astype(jnp.float32))

    out = pl.pallas_call(
        make_fused_kernel(n),
        out_shape=jax.ShapeDtypeStruct((8, F), jnp.float32),  # lane-dense
        in_specs=[_vmem() for _ in range(14)],
        out_specs=_vmem(),
    )(xpad, adj.astype(jnp.float32),
      kp['conv_w'], kp['conv_b'], kp['g1_w'], kp['g1_b'],
      kp['press_B'], kp['press_b'], kp['gh_w'], kp['gh_b'],
      kp['c1_w'], kp['c1_b'], kp['c2_w'], kp['c2_b'])

    return out[0:1, :N_CLASSES]                              # [1, num_labels]


if __name__ == "__main__":
    key = jax.random.PRNGKey(0)
    kparam, kh, ka, km = jax.random.split(key, 4)
    N = 16  # number of graph nodes

    params = init_params(kparam)
    packed = pack_params(params)

    h = jax.random.normal(kh, (N, F), jnp.float32)            # graph.ndata['h']
    # dense weighted adjacency: A[dst, src] = edge weight (graph.edata['f'])
    ew = jax.random.uniform(ka, (N, N), jnp.float32)
    mask = (jax.random.uniform(km, (N, N)) < 0.3).astype(jnp.float32)
    adj = ew * mask

    out = eq_classifier_forward(h, adj, packed)
    jax.block_until_ready(out)
    assert out.shape == (1, N_CLASSES) and out.dtype == jnp.float32
    print("KERNEL_OK")
</pallas_src>

<mosaic_0001>
module attributes {stable_mosaic.version = 11 : i64} {
  func.func @kernel(%arg0: memref<24x128xf32, #tpu.memory_space<vmem>>, %arg1: memref<16x16xf32, #tpu.memory_space<vmem>>, %arg2: memref<3x384x128xbf16, #tpu.memory_space<vmem>>, %arg3: memref<3x128xf32, #tpu.memory_space<vmem>>, %arg4: memref<3x128x128xbf16, #tpu.memory_space<vmem>>, %arg5: memref<1x384xf32, #tpu.memory_space<vmem>>, %arg6: memref<384x128xbf16, #tpu.memory_space<vmem>>, %arg7: memref<1x128xf32, #tpu.memory_space<vmem>>, %arg8: memref<3x128x128xbf16, #tpu.memory_space<vmem>>, %arg9: memref<3x128xf32, #tpu.memory_space<vmem>>, %arg10: memref<384x128xbf16, #tpu.memory_space<vmem>>, %arg11: memref<1x128xf32, #tpu.memory_space<vmem>>, %arg12: memref<128x128xbf16, #tpu.memory_space<vmem>>, %arg13: memref<1x128xf32, #tpu.memory_space<vmem>>, %arg14: memref<8x128xf32, #tpu.memory_space<vmem>>) attributes {dimension_semantics = [], scalar_prefetch = 0 : i64, scratch_operands = 0 : i64, tpu.core_type = #tpu.core_type<tc>} {
    %c0 = arith.constant 0 : index
    %c0_0 = arith.constant 0 : index
    %0 = vector.load %arg1[%c0, %c0_0] : memref<16x16xf32, #tpu.memory_space<vmem>>, vector<16x16xf32>
    %c3 = arith.constant 3 : index
    %c0_1 = arith.constant 0 : index
    %1 = vector.load %arg0[%c3, %c0_1] : memref<24x128xf32, #tpu.memory_space<vmem>>, vector<16x128xf32>
    %c2 = arith.constant 2 : index
    %c0_2 = arith.constant 0 : index
    %2 = vector.load %arg0[%c2, %c0_2] : memref<24x128xf32, #tpu.memory_space<vmem>>, vector<16x128xf32>
    %c4 = arith.constant 4 : index
    %c0_3 = arith.constant 0 : index
    %3 = vector.load %arg0[%c4, %c0_3] : memref<24x128xf32, #tpu.memory_space<vmem>>, vector<16x128xf32>
    %4 = tpu.concatenate %2, %1, %3 in 1 : vector<16x128xf32>, vector<16x128xf32>, vector<16x128xf32> -> vector<16x384xf32>
    %5 = arith.truncf %4 : vector<16x384xf32> to vector<16x384xbf16>
    %c0_4 = arith.constant 0 : index
    %c0_5 = arith.constant 0 : index
    %c0_6 = arith.constant 0 : index
    %6 = vector.load %arg2[%c0_4, %c0_5, %c0_6] : memref<3x384x128xbf16, #tpu.memory_space<vmem>>, vector<1x384x128xbf16>
    %7 = vector.shape_cast %6 : vector<1x384x128xbf16> to vector<384x128xbf16>
    %cst = arith.constant dense<0.000000e+00> : vector<16x128xf32>
    %8 = tpu.matmul %5, %7, %cst {dimension_numbers = #tpu.dot_dimension_numbers<[1], [0], [0], [1], [0, 0, 1, 1], [], []>} : vector<16x384xbf16>, vector<384x128xbf16>, vector<16x128xf32> -> vector<16x128xf32>
    %c0_7 = arith.constant 0 : index
    %c0_8 = arith.constant 0 : index
    %9 = vector.load %arg3[%c0_7, %c0_8] : memref<3x128xf32, #tpu.memory_space<vmem>>, vector<1x128xf32>
    %10 = vector.broadcast %9 : vector<1x128xf32> to vector<16x128xf32>
    %11 = arith.addf %8, %10 : vector<16x128xf32>
    %c1 = arith.constant 1 : index
    %c0_9 = arith.constant 0 : index
    %12 = vector.load %arg0[%c1, %c0_9] : memref<24x128xf32, #tpu.memory_space<vmem>>, vector<16x128xf32>
    %c5 = arith.constant 5 : index
    %c0_10 = arith.constant 0 : index
    %13 = vector.load %arg0[%c5, %c0_10] : memref<24x128xf32, #tpu.memory_space<vmem>>, vector<16x128xf32>
    %14 = tpu.concatenate %12, %1, %13 in 1 : vector<16x128xf32>, vector<16x128xf32>, vector<16x128xf32> -> vector<16x384xf32>
    %15 = arith.truncf %14 : vector<16x384xf32> to vector<16x384xbf16>
    %c1_11 = arith.constant 1 : index
    %c0_12 = arith.constant 0 : index
    %c0_13 = arith.constant 0 : index
    %16 = vector.load %arg2[%c1_11, %c0_12, %c0_13] : memref<3x384x128xbf16, #tpu.memory_space<vmem>>, vector<1x384x128xbf16>
    %17 = vector.shape_cast %16 : vector<1x384x128xbf16> to vector<384x128xbf16>
    %cst_14 = arith.constant dense<0.000000e+00> : vector<16x128xf32>
    %18 = tpu.matmul %15, %17, %cst_14 {dimension_numbers = #tpu.dot_dimension_numbers<[1], [0], [0], [1], [0, 0, 1, 1], [], []>} : vector<16x384xbf16>, vector<384x128xbf16>, vector<16x128xf32> -> vector<16x128xf32>
    %c1_15 = arith.constant 1 : index
    %c0_16 = arith.constant 0 : index
    %19 = vector.load %arg3[%c1_15, %c0_16] : memref<3x128xf32, #tpu.memory_space<vmem>>, vector<1x128xf32>
    %20 = vector.broadcast %19 : vector<1x128xf32> to vector<16x128xf32>
    %21 = arith.addf %18, %20 : vector<16x128xf32>
    %c0_17 = arith.constant 0 : index
    %c0_18 = arith.constant 0 : index
    %22 = vector.load %arg0[%c0_17, %c0_18] : memref<24x128xf32, #tpu.memory_space<vmem>>, vector<16x128xf32>
    %c6 = arith.constant 6 : index
    %c0_19 = arith.constant 0 : index
    %23 = vector.load %arg0[%c6, %c0_19] : memref<24x128xf32, #tpu.memory_space<vmem>>, vector<16x128xf32>
    %24 = tpu.concatenate %22, %1, %23 in 1 : vector<16x128xf32>, vector<16x128xf32>, vector<16x128xf32> -> vector<16x384xf32>
    %25 = arith.truncf %24 : vector<16x384xf32> to vector<16x384xbf16>
    %c2_20 = arith.constant 2 : index
    %c0_21 = arith.constant 0 : index
    %c0_22 = arith.constant 0 : index
    %26 = vector.load %arg2[%c2_20, %c0_21, %c0_22] : memref<3x384x128xbf16, #tpu.memory_space<vmem>>, vector<1x384x128xbf16>
    %27 = vector.shape_cast %26 : vector<1x384x128xbf16> to vector<384x128xbf16>
    %cst_23 = arith.constant dense<0.000000e+00> : vector<16x128xf32>
    %28 = tpu.matmul %25, %27, %cst_23 {dimension_numbers = #tpu.dot_dimension_numbers<[1], [0], [0], [1], [0, 0, 1, 1], [], []>} : vector<16x384xbf16>, vector<384x128xbf16>, vector<16x128xf32> -> vector<16x128xf32>
    %c2_24 = arith.constant 2 : index
    %c0_25 = arith.constant 0 : index
    %29 = vector.load %arg3[%c2_24, %c0_25] : memref<3x128xf32, #tpu.memory_space<vmem>>, vector<1x128xf32>
    %30 = vector.broadcast %29 : vector<1x128xf32> to vector<16x128xf32>
    %31 = arith.addf %28, %30 : vector<16x128xf32>
    %cst_26 = arith.constant 0.000000e+00 : f32
    %32 = vector.broadcast %cst_26 : f32 to vector<16x128xf32>
    %33 = arith.maximumf %11, %32 : vector<16x128xf32>
    %34 = arith.addf %33, %21 : vector<16x128xf32>
    %cst_27 = arith.constant 0.000000e+00 : f32
    %35 = vector.broadcast %cst_27 : f32 to vector<16x128xf32>
    %36 = arith.maximumf %21, %35 : vector<16x128xf32>
    %37 = arith.addf %36, %31 : vector<16x128xf32>
    %cst_28 = arith.constant 0.000000e+00 : f32
    %38 = vector.broadcast %cst_28 : f32 to vector<16x128xf32>
    %39 = arith.maximumf %31, %38 : vector<16x128xf32>
    %40 = arith.addf %39, %11 : vector<16x128xf32>
    %41 = tpu.concatenate %34, %37, %40 in 1 : vector<16x128xf32>, vector<16x128xf32>, vector<16x128xf32> -> vector<16x384xf32>
    %cst_29 = arith.constant dense<0.000000e+00> : vector<384xf32>
    %42 = vector.multi_reduction <add>, %41, %cst_29 [0] : vector<16x384xf32> to vector<384xf32>
    %43 = vector.shape_cast %42 : vector<384xf32> to vector<1x384xf32>
    %cst_30 = arith.constant 1.600000e+01 : f32
    %44 = vector.broadcast %cst_30 : f32 to vector<1x384xf32>
    %45 = arith.divf %43, %44 : vector<1x384xf32>
    %46 = vector.broadcast %45 : vector<1x384xf32> to vector<16x384xf32>
    %47 = arith.subf %41, %46 : vector<16x384xf32>
    %48 = arith.mulf %47, %47 : vector<16x384xf32>
    %cst_31 = arith.constant dense<0.000000e+00> : vector<384xf32>
    %49 = vector.multi_reduction <add>, %48, %cst_31 [0] : vector<16x384xf32> to vector<384xf32>
    %50 = vector.shape_cast %49 : vector<384xf32> to vector<1x384xf32>
    %cst_32 = arith.constant 1.600000e+01 : f32
    %51 = vector.broadcast %cst_32 : f32 to vector<1x384xf32>
    %52 = arith.divf %50, %51 : vector<1x384xf32>
    %53 = vector.broadcast %45 : vector<1x384xf32> to vector<16x384xf32>
    %54 = arith.subf %41, %53 : vector<16x384xf32>
    %cst_33 = arith.constant 9.99999974E-6 : f32
    %55 = vector.broadcast %cst_33 : f32 to vector<1x384xf32>
    %56 = arith.addf %52, %55 : vector<1x384xf32>
    %57 = math.rsqrt %56 : vector<1x384xf32>
    %58 = vector.broadcast %57 : vector<1x384xf32> to vector<16x384xf32>
    %59 = arith.mulf %54, %58 : vector<16x384xf32>
    %cst_34 = arith.constant dense<0.000000e+00> : vector<16x384xf32>
    %60 = tpu.matmul %0, %59, %cst_34 {dimension_numbers = #tpu.dot_dimension_numbers<[1], [0], [0], [1], [0, 0, 1, 1], [], []>} : vector<16x16xf32>, vector<16x384xf32>, vector<16x384xf32> -> vector<16x384xf32>
    %61 = arith.truncf %60 : vector<16x384xf32> to vector<16x384xbf16>
    %62 = vector.extract_strided_slice %61 {offsets = [0, 0], sizes = [16, 128], strides = [1, 1]} : vector<16x384xbf16> to vector<16x128xbf16>
    %c0_35 = arith.constant 0 : index
    %c0_36 = arith.constant 0 : index
    %c0_37 = arith.constant 0 : index
    %63 = vector.load %arg4[%c0_35, %c0_36, %c0_37] : memref<3x128x128xbf16, #tpu.memory_space<vmem>>, vector<1x128x128xbf16>
    %64 = vector.shape_cast %63 : vector<1x128x128xbf16> to vector<128x128xbf16>
    %cst_38 = arith.constant dense<0.000000e+00> : vector<16x128xf32>
    %65 = tpu.matmul %62, %64, %cst_38 {dimension_numbers = #tpu.dot_dimension_numbers<[1], [0], [0], [1], [0, 0, 1, 1], [], []>} : vector<16x128xbf16>, vector<128x128xbf16>, vector<16x128xf32> -> vector<16x128xf32>
    %66 = vector.extract_strided_slice %61 {offsets = [0, 128], sizes = [16, 128], strides = [1, 1]} : vector<16x384xbf16> to vector<16x128xbf16>
    %c1_39 = arith.constant 1 : index
    %c0_40 = arith.constant 0 : index
    %c0_41 = arith.constant 0 : index
    %67 = vector.load %arg4[%c1_39, %c0_40, %c0_41] : memref<3x128x128xbf16, #tpu.memory_space<vmem>>, vector<1x128x128xbf16>
    %68 = vector.shape_cast %67 : vector<1x128x128xbf16> to vector<128x128xbf16>
    %cst_42 = arith.constant dense<0.000000e+00> : vector<16x128xf32>
    %69 = tpu.matmul %66, %68, %cst_42 {dimension_numbers = #tpu.dot_dimension_numbers<[1], [0], [0], [1], [0, 0, 1, 1], [], []>} : vector<16x128xbf16>, vector<128x128xbf16>, vector<16x128xf32> -> vector<16x128xf32>
    %70 = vector.extract_strided_slice %61 {offsets = [0, 256], sizes = [16, 128], strides = [1, 1]} : vector<16x384xbf16> to vector<16x128xbf16>
    %c2_43 = arith.constant 2 : index
    %c0_44 = arith.constant 0 : index
    %c0_45 = arith.constant 0 : index
    %71 = vector.load %arg4[%c2_43, %c0_44, %c0_45] : memref<3x128x128xbf16, #tpu.memory_space<vmem>>, vector<1x128x128xbf16>
    %72 = vector.shape_cast %71 : vector<1x128x128xbf16> to vector<128x128xbf16>
    %cst_46 = arith.constant dense<0.000000e+00> : vector<16x128xf32>
    %73 = tpu.matmul %70, %72, %cst_46 {dimension_numbers = #tpu.dot_dimension_numbers<[1], [0], [0], [1], [0, 0, 1, 1], [], []>} : vector<16x128xbf16>, vector<128x128xbf16>, vector<16x128xf32> -> vector<16x128xf32>
    %74 = tpu.concatenate %65, %69, %73 in 1 : vector<16x128xf32>, vector<16x128xf32>, vector<16x128xf32> -> vector<16x384xf32>
    %c0_47 = arith.constant 0 : index
    %c0_48 = arith.constant 0 : index
    %75 = vector.load %arg5[%c0_47, %c0_48] : memref<1x384xf32, #tpu.memory_space<vmem>>, vector<1x384xf32>
    %76 = vector.broadcast %75 : vector<1x384xf32> to vector<16x384xf32>
    %77 = arith.addf %74, %76 : vector<16x384xf32>
    %cst_49 = arith.constant 0.000000e+00 : f32
    %78 = vector.broadcast %cst_49 : f32 to vector<16x384xf32>
    %79 = arith.maximumf %77, %78 : vector<16x384xf32>
    %80 = arith.truncf %79 : vector<16x384xf32> to vector<16x384xbf16>
    %c0_50 = arith.constant 0 : index
    %c0_51 = arith.constant 0 : index
    %81 = vector.load %arg6[%c0_50, %c0_51] : memref<384x128xbf16, #tpu.memory_space<vmem>>, vector<384x128xbf16>
    %cst_52 = arith.constant dense<0.000000e+00> : vector<16x128xf32>
    %82 = tpu.matmul %80, %81, %cst_52 {dimension_numbers = #tpu.dot_dimension_numbers<[1], [0], [0], [1], [0, 0, 1, 1], [], []>} : vector<16x384xbf16>, vector<384x128xbf16>, vector<16x128xf32> -> vector<16x128xf32>
    %c0_53 = arith.constant 0 : index
    %c0_54 = arith.constant 0 : index
    %83 = vector.load %arg7[%c0_53, %c0_54] : memref<1x128xf32, #tpu.memory_space<vmem>>, vector<1x128xf32>
    %84 = vector.broadcast %83 : vector<1x128xf32> to vector<16x128xf32>
    %85 = arith.addf %82, %84 : vector<16x128xf32>
    %cst_55 = arith.constant dense<0.000000e+00> : vector<128xf32>
    %86 = vector.multi_reduction <add>, %85, %cst_55 [0] : vector<16x128xf32> to vector<128xf32>
    %87 = vector.shape_cast %86 : vector<128xf32> to vector<1x128xf32>
    %cst_56 = arith.constant 1.600000e+01 : f32
    %88 = vector.broadcast %cst_56 : f32 to vector<1x128xf32>
    %89 = arith.divf %87, %88 : vector<1x128xf32>
    %90 = vector.broadcast %89 : vector<1x128xf32> to vector<16x128xf32>
    %91 = arith.subf %85, %90 : vector<16x128xf32>
    %92 = arith.mulf %91, %91 : vector<16x128xf32>
    %cst_57 = arith.constant dense<0.000000e+00> : vector<128xf32>
    %93 = vector.multi_reduction <add>, %92, %cst_57 [0] : vector<16x128xf32> to vector<128xf32>
    %94 = vector.shape_cast %93 : vector<128xf32> to vector<1x128xf32>
    %cst_58 = arith.constant 1.600000e+01 : f32
    %95 = vector.broadcast %cst_58 : f32 to vector<1x128xf32>
    %96 = arith.divf %94, %95 : vector<1x128xf32>
    %97 = vector.broadcast %89 : vector<1x128xf32> to vector<16x128xf32>
    %98 = arith.subf %85, %97 : vector<16x128xf32>
    %cst_59 = arith.constant 9.99999974E-6 : f32
    %99 = vector.broadcast %cst_59 : f32 to vector<1x128xf32>
    %100 = arith.addf %96, %99 : vector<1x128xf32>
    %101 = math.rsqrt %100 : vector<1x128xf32>
    %102 = vector.broadcast %101 : vector<1x128xf32> to vector<16x128xf32>
    %103 = arith.mulf %98, %102 : vector<16x128xf32>
    %c0_60 = arith.constant 0 : index
    %c0_61 = arith.constant 0 : index
    %c0_62 = arith.constant 0 : index
    %104 = vector.load %arg8[%c0_60, %c0_61, %c0_62] : memref<3x128x128xbf16, #tpu.memory_space<vmem>>, vector<1x128x128xbf16>
    %105 = vector.shape_cast %104 : vector<1x128x128xbf16> to vector<128x128xbf16>
    %c0_63 = arith.constant 0 : index
    %c0_64 = arith.constant 0 : index
    %106 = vector.load %arg9[%c0_63, %c0_64] : memref<3x128xf32, #tpu.memory_space<vmem>>, vector<1x128xf32>
    %cst_65 = arith.constant dense<0.000000e+00> : vector<16x128xf32>
    %107 = tpu.matmul %0, %103, %cst_65 {dimension_numbers = #tpu.dot_dimension_numbers<[1], [0], [0], [1], [0, 0, 1, 1], [], []>} : vector<16x16xf32>, vector<16x128xf32>, vector<16x128xf32> -> vector<16x128xf32>
    %108 = arith.truncf %107 : vector<16x128xf32> to vector<16x128xbf16>
    %cst_66 = arith.constant dense<0.000000e+00> : vector<16x128xf32>
    %109 = tpu.matmul %108, %105, %cst_66 {dimension_numbers = #tpu.dot_dimension_numbers<[1], [0], [0], [1], [0, 0, 1, 1], [], []>} : vector<16x128xbf16>, vector<128x128xbf16>, vector<16x128xf32> -> vector<16x128xf32>
    %110 = vector.broadcast %106 : vector<1x128xf32> to vector<16x128xf32>
    %111 = arith.addf %109, %110 : vector<16x128xf32>
    %cst_67 = arith.constant 0.000000e+00 : f32
    %112 = vector.broadcast %cst_67 : f32 to vector<16x128xf32>
    %113 = arith.maximumf %111, %112 : vector<16x128xf32>
    %c1_68 = arith.constant 1 : index
    %c0_69 = arith.constant 0 : index
    %c0_70 = arith.constant 0 : index
    %114 = vector.load %arg8[%c1_68, %c0_69, %c0_70] : memref<3x128x128xbf16, #tpu.memory_space<vmem>>, vector<1x128x128xbf16>
    %115 = vector.shape_cast %114 : vector<1x128x128xbf16> to vector<128x128xbf16>
    %c1_71 = arith.constant 1 : index
    %c0_72 = arith.constant 0 : index
    %116 = vector.load %arg9[%c1_71, %c0_72] : memref<3x128xf32, #tpu.memory_space<vmem>>, vector<1x128xf32>
    %cst_73 = arith.constant dense<0.000000e+00> : vector<16x128xf32>
    %117 = tpu.matmul %0, %113, %cst_73 {dimension_numbers = #tpu.dot_dimension_numbers<[1], [0], [0], [1], [0, 0, 1, 1], [], []>} : vector<16x16xf32>, vector<16x128xf32>, vector<16x128xf32> -> vector<16x128xf32>
    %118 = arith.truncf %117 : vector<16x128xf32> to vector<16x128xbf16>
    %cst_74 = arith.constant dense<0.000000e+00> : vector<16x128xf32>
    %119 = tpu.matmul %118, %115, %cst_74 {dimension_numbers = #tpu.dot_dimension_numbers<[1], [0], [0], [1], [0, 0, 1, 1], [], []>} : vector<16x128xbf16>, vector<128x128xbf16>, vector<16x128xf32> -> vector<16x128xf32>
    %120 = vector.broadcast %116 : vector<1x128xf32> to vector<16x128xf32>
    %121 = arith.addf %119, %120 : vector<16x128xf32>
    %cst_75 = arith.constant 0.000000e+00 : f32
    %122 = vector.broadcast %cst_75 : f32 to vector<16x128xf32>
    %123 = arith.maximumf %121, %122 : vector<16x128xf32>
    %c2_76 = arith.constant 2 : index
    %c0_77 = arith.constant 0 : index
    %c0_78 = arith.constant 0 : index
    %124 = vector.load %arg8[%c2_76, %c0_77, %c0_78] : memref<3x128x128xbf16, #tpu.memory_space<vmem>>, vector<1x128x128xbf16>
    %125 = vector.shape_cast %124 : vector<1x128x128xbf16> to vector<128x128xbf16>
    %c2_79 = arith.constant 2 : index
    %c0_80 = arith.constant 0 : index
    %126 = vector.load %arg9[%c2_79, %c0_80] : memref<3x128xf32, #tpu.memory_space<vmem>>, vector<1x128xf32>
    %cst_81 = arith.constant dense<0.000000e+00> : vector<16x128xf32>
    %127 = tpu.matmul %0, %123, %cst_81 {dimension_numbers = #tpu.dot_dimension_numbers<[1], [0], [0], [1], [0, 0, 1, 1], [], []>} : vector<16x16xf32>, vector<16x128xf32>, vector<16x128xf32> -> vector<16x128xf32>
    %128 = arith.truncf %127 : vector<16x128xf32> to vector<16x128xbf16>
    %cst_82 = arith.constant dense<0.000000e+00> : vector<16x128xf32>
    %129 = tpu.matmul %128, %125, %cst_82 {dimension_numbers = #tpu.dot_dimension_numbers<[1], [0], [0], [1], [0, 0, 1, 1], [], []>} : vector<16x128xbf16>, vector<128x128xbf16>, vector<16x128xf32> -> vector<16x128xf32>
    %130 = vector.broadcast %126 : vector<1x128xf32> to vector<16x128xf32>
    %131 = arith.addf %129, %130 : vector<16x128xf32>
    %cst_83 = arith.constant 0.000000e+00 : f32
    %132 = vector.broadcast %cst_83 : f32 to vector<16x128xf32>
    %133 = arith.maximumf %131, %132 : vector<16x128xf32>
    %134 = tpu.concatenate %113, %123, %133 in 1 : vector<16x128xf32>, vector<16x128xf32>, vector<16x128xf32> -> vector<16x384xf32>
    %cst_84 = arith.constant dense<0.000000e+00> : vector<384xf32>
    %135 = vector.multi_reduction <add>, %134, %cst_84 [0] : vector<16x384xf32> to vector<384xf32>
    %136 = vector.shape_cast %135 : vector<384xf32> to vector<1x384xf32>
    %137 = vector.shape_cast %136 : vector<1x384xf32> to vector<1x384xf32>
    %138 = vector.broadcast %137 : vector<1x384xf32> to vector<8x384xf32>
    %139 = arith.truncf %138 : vector<8x384xf32> to vector<8x384xbf16>
    %c0_85 = arith.constant 0 : index
    %c0_86 = arith.constant 0 : index
    %140 = vector.load %arg10[%c0_85, %c0_86] : memref<384x128xbf16, #tpu.memory_space<vmem>>, vector<384x128xbf16>
    %cst_87 = arith.constant dense<0.000000e+00> : vector<8x128xf32>
    %141 = tpu.matmul %139, %140, %cst_87 {dimension_numbers = #tpu.dot_dimension_numbers<[1], [0], [0], [1], [0, 0, 1, 1], [], []>} : vector<8x384xbf16>, vector<384x128xbf16>, vector<8x128xf32> -> vector<8x128xf32>
    %c0_88 = arith.constant 0 : index
    %c0_89 = arith.constant 0 : index
    %142 = vector.load %arg11[%c0_88, %c0_89] : memref<1x128xf32, #tpu.memory_space<vmem>>, vector<1x128xf32>
    %143 = vector.broadcast %142 : vector<1x128xf32> to vector<8x128xf32>
    %144 = arith.addf %141, %143 : vector<8x128xf32>
    %145 = arith.truncf %144 : vector<8x128xf32> to vector<8x128xbf16>
    %c0_90 = arith.constant 0 : index
    %c0_91 = arith.constant 0 : index
    %146 = vector.load %arg12[%c0_90, %c0_91] : memref<128x128xbf16, #tpu.memory_space<vmem>>, vector<128x128xbf16>
    %cst_92 = arith.constant dense<0.000000e+00> : vector<8x128xf32>
    %147 = tpu.matmul %145, %146, %cst_92 {dimension_numbers = #tpu.dot_dimension_numbers<[1], [0], [0], [1], [0, 0, 1, 1], [], []>} : vector<8x128xbf16>, vector<128x128xbf16>, vector<8x128xf32> -> vector<8x128xf32>
    %c0_93 = arith.constant 0 : index
    %c0_94 = arith.constant 0 : index
    %148 = vector.load %arg13[%c0_93, %c0_94] : memref<1x128xf32, #tpu.memory_space<vmem>>, vector<1x128xf32>
    %149 = vector.broadcast %148 : vector<1x128xf32> to vector<8x128xf32>
    %150 = arith.addf %147, %149 : vector<8x128xf32>
    %c0_95 = arith.constant 0 : index
    %c0_96 = arith.constant 0 : index
    %151 = vector.load %arg14[%c0_95, %c0_96] : memref<8x128xf32, #tpu.memory_space<vmem>>, vector<8x128xf32>
    tpu.vector_store %arg14[%c0_95, %c0_96], %150 {strides = array<i32>} : memref<8x128xf32, #tpu.memory_space<vmem>>, vector<8x128xf32>,
    return
  }
}

</mosaic_0001>

<bundles_post_ra>
// kernel: eq_classifier_forward.1
= control target key start
LH: loop header
LB: loop body
LE: loop exit
PB: predicated region body
PF: predicated region fallthrough
CT: control target
= control target key end

     0   :  { %19 = vsyncpa [#allocation3], 0  ;;  %s4255_s0 = inlined_call_operand.vmem [shape: f32[24,128], index: 0, kind: input, shape index: {}]   ;;  %s4256_s1 = inlined_call_operand.vmem [shape: f32[16,16], index: 1, kind: input, shape index: {}]   ;;  %s4257_s2 = inlined_call_operand.hbm [shape: bf16[3,384,128], index: 2, kind: input, shape index: {}]   ;;  %s4258_s3 = inlined_call_operand.vmem [shape: f32[3,128], index: 3, kind: input, shape index: {}]   ;;  %s4259_s4 = inlined_call_operand.hbm [shape: bf16[3,128,128], index: 4, kind: input, shape index: {}]   ;;  %s4260_s5 = inlined_call_operand.vmem [shape: f32[1,384], index: 5, kind: input, shape index: {}]   ;;  %s4261_s6 = inlined_call_operand.hbm [shape: bf16[384,128], index: 6, kind: input, shape index: {}]   ;;  %s4262_s7 = inlined_call_operand.vmem [shape: f32[1,128], index: 7, kind: input, shape index: {}]   ;;  %s4263_s8 = inlined_call_operand.hbm [shape: bf16[3,128,128], index: 8, kind: input, shape index: {}]   ;;  %s4264_s9 = inlined_call_operand.vmem [shape: f32[3,128], index: 9, kind: input, shape index: {}]   ;;  %s4265_s10 = inlined_call_operand.hbm [shape: bf16[384,128], index: 10, kind: input, shape index: {}]   ;;  %s4266_s11 = inlined_call_operand.vmem [shape: f32[1,128], index: 11, kind: input, shape index: {}]   ;;  %s4267_s12 = inlined_call_operand.hbm [shape: bf16[128,128], index: 12, kind: input, shape index: {}]   ;;  %s4268_s13 = inlined_call_operand.vmem [shape: f32[1,128], index: 13, kind: input, shape index: {}]   ;;  %s4269_s14 = inlined_call_operand.vmem [shape: f32[8,128], index: 14, kind: output, shape index: {}]  }
   0x1   :  { %20 = vsyncpa [#allocation5], 0 }
   0x2   :  { %21 = vsyncpa [#allocation8], 0 }
   0x3   :  { %22 = vsyncpa [#allocation11], 0  ;;  %s3902_s29 = smov [#allocation4]   ;;  %s3903_s15 = smov [#allocation7]  }
   0x4   :  { %s46_s30 = sshll.u32 %s3902_s29, 4  ;;  %s74_s16 = sshll.u32 %s3903_s15, 4  ;;  %s47_s30 = int_to_ptr.vmem [resolvable:$true] %s46_s30  ;;  %s75_s16 = int_to_ptr.vmem [resolvable:$true] %s74_s16 }
   0x5   :  { %s3782_s17 = scalar_lea.vmem %s47_s30, 3072  ;;  %p3787_p1 = scmp.lt.s32.totalorder %s47_s30, %s47_s30 }
   0x6   :  { %p3783_p0 = scmp.ne.s32.totalorder %s47_s30, %s3782_s17  ;;  %p3788_p2 = scmp.lt.s32.totalorder %s3782_s17, %s3782_s17 }
   0x8   :  { %p3789_p3 = por %p3788_p2, %p3787_p1 }
   0xa   :  { %p3790_p4 = pnand %p3789_p3, %p3783_p0 }
   0xc   :  { %3793 = shalt.err (!%p3790_p4)
}
   0xd   :  { %s3904_s18 = smov 64   ;;  %s3905_s19 = smov 4  }
   0xe   :  { %52 = dma.hbm_to_vmem [thread:$0]  %s4259_s4, 3072, %s47_s30, [#allocation5], %s3904_s18, %s3904_s18, %s3905_s19  }
   0xf   :  { %s3802_s22 = scalar_lea.vmem %s75_s16, 3072  ;;  %p3807_p6 = scmp.lt.s32.totalorder %s75_s16, %s75_s16 }
  0x10   :  { %p3803_p5 = scmp.ne.s32.totalorder %s75_s16, %s3802_s22  ;;  %p3808_p7 = scmp.lt.s32.totalorder %s3802_s22, %s3802_s22 }
  0x12   :  { %p3809_p8 = por %p3808_p7, %p3807_p6 }
  0x14   :  { %p3810_p9 = pnand %p3809_p8, %p3803_p5 }
  0x16   :  { %3813 = shalt.err (!%p3810_p9)
}
  0x17   :  { %80 = dma.hbm_to_vmem [thread:$0]  %s4263_s8, 3072, %s75_s16, [#allocation8], %s3904_s18, %s3904_s18, %s3905_s19  }
  0x18   :  { %s3906_s25 = smov [#allocation2]   ;;  %s3907_s27 = smov [#allocation6]  }
  0x19   :  { %s32_s26 = sshll.u32 %s3906_s25, 4  ;;  %s60_s28 = sshll.u32 %s3907_s27, 4  ;;  %s33_s26 = int_to_ptr.vmem [resolvable:$true] %s32_s26  ;;  %s61_s28 = int_to_ptr.vmem [resolvable:$true] %s60_s28 }
  0x1a   :  { %s3822_s4 = scalar_lea.vmem %s33_s26, 9216  ;;  %p3827_p11 = scmp.lt.s32.totalorder %s33_s26, %s33_s26 }
  0x1b   :  { %p3823_p10 = scmp.ne.s32.totalorder %s33_s26, %s3822_s4  ;;  %p3828_p12 = scmp.lt.s32.totalorder %s3822_s4, %s3822_s4 }
  0x1d   :  { %p3829_p13 = por %p3828_p12, %p3827_p11 }
  0x1f   :  { %p3830_p0 = pnand %p3829_p13, %p3823_p10 }
  0x21   :  { %3833 = shalt.err (!%p3830_p0)
}
  0x22   :  { %38 = dma.hbm_to_vmem [thread:$0]  %s4257_s2, 9216, %s33_s26, [#allocation3], %s3904_s18, %s3904_s18, %s3905_s19  }
  0x23   :  { %s3842_s8 = scalar_lea.vmem %s61_s28, 3072  ;;  %p3847_p2 = scmp.lt.s32.totalorder %s61_s28, %s61_s28 }
  0x24   :  { %p3843_p1 = scmp.ne.s32.totalorder %s61_s28, %s3842_s8  ;;  %p3848_p3 = scmp.lt.s32.totalorder %s3842_s8, %s3842_s8 }
  0x26   :  { %p3849_p4 = por %p3848_p3, %p3847_p2 }
  0x28   :  { %p3850_p5 = pnand %p3849_p4, %p3843_p1 }
  0x2a   :  { %3853 = shalt.err (!%p3850_p5)
}
  0x2b   :  { %66 = dma.hbm_to_vmem [thread:$0]  %s4261_s6, 3072, %s61_s28, [#allocation5], %s3904_s18, %s3904_s18, %s3905_s19  }
  0x2c   :  { %s3908_s17 = smov [#allocation9]   ;;  %s3909_s21 = smov [#allocation10]  }
  0x2d   :  { %s88_s20 = sshll.u32 %s3908_s17, 4  ;;  %s102_s22 = sshll.u32 %s3909_s21, 4  ;;  %s89_s20 = int_to_ptr.vmem [resolvable:$true] %s88_s20  ;;  %s103_s22 = int_to_ptr.vmem [resolvable:$true] %s102_s22 }
  0x2e   :  { %s3862_s2 = scalar_lea.vmem %s89_s20, 3072  ;;  %p3867_p7 = scmp.lt.s32.totalorder %s89_s20, %s89_s20 }
  0x2f   :  { %p3863_p6 = scmp.ne.s32.totalorder %s89_s20, %s3862_s2  ;;  %p3868_p8 = scmp.lt.s32.totalorder %s3862_s2, %s3862_s2 }
  0x31   :  { %p3869_p9 = por %p3868_p8, %p3867_p7 }
  0x33   :  { %p3870_p10 = pnand %p3869_p9, %p3863_p6 }
  0x35   :  { %3873 = shalt.err (!%p3870_p10)
}
  0x36   :  { %94 = dma.hbm_to_vmem [thread:$0]  %s4265_s10, 3072, %s89_s20, [#allocation8], %s3904_s18, %s3904_s18, %s3905_s19  }
  0x37   :  { %s3882_s6 = scalar_lea.vmem %s103_s22, 1024  ;;  %p3887_p12 = scmp.lt.s32.totalorder %s103_s22, %s103_s22 }
  0x38   :  { %p3883_p11 = scmp.ne.s32.totalorder %s103_s22, %s3882_s6  ;;  %p3888_p13 = scmp.lt.s32.totalorder %s3882_s6, %s3882_s6 }
  0x3a   :  { %p3889_p0 = por %p3888_p13, %p3887_p12 }
  0x3c   :  { %p3890_p1 = pnand %p3889_p0, %p3883_p11 }
  0x3e   :  { %3893 = shalt.err (!%p3890_p1)
}
  0x3f   :  { %108 = dma.hbm_to_vmem [thread:$0]  %s4267_s12, 1024, %s103_s22, [#allocation11], %s3904_s18, %s3904_s18, %s3905_s19  }
  0x40   :  { %3894 = dma.done.wait [#allocation3], 9216  }
  0x41   :  { %3895 = vsyncadd [#allocation3], 4294958080 }
  0x42   :  { %3896 = dma.done.wait [#allocation5], 6144  }
  0x43   :  { %3897 = vsyncadd [#allocation5], 4294961152 }
  0x44   :  { %3898 = dma.done.wait [#allocation8], 6144  }
  0x45   :  { %3899 = vsyncadd [#allocation8], 4294961152 }
  0x46   :  { %3900 = dma.done.wait [#allocation11], 1024  }
  0x47   :  { %3901 = vsyncadd [#allocation11], 4294966272  ;;  %v3910_v0 = vmov 0.0   ;;  %vm3911_vm0 = vmmov 0   ;;  %v3590_v1 = vld [vmem:[#allocation2 + $0x78] sm:$0xff]   ;;  %v3593_v4 = vld [vmem:[#allocation2 + $0x70] sm:$0xff]  }
  0x48   :  { %3312 = vmatprep.subr.bf16.mxu1 %v3910_v0  ;;  %3328 = vmatprep.mubr.msk.bf16.mxu1 %vm3911_vm0, %v3910_v0  ;;  %v3591_v2 = vld [vmem:[#allocation2 + $0x38] sm:$0xff]   ;;  %v3594_v5 = vld [vmem:[#allocation2 + $0x30] sm:$0xff]   ;;  %v3596_v7 = vld [vmem:[#allocation2 + $0x68] sm:$0xff]   ;;  %vm1077_vm1 = vcmask 130048  }
  0x49   :  { %3078 = vmatprep.subr.bf16.mxu0 %v3590_v1  ;;  %v3592_v3 = vld [vmem:[#allocation2 + $0xb8] sm:$0xff]   ;;  %v3595_v6 = vld [vmem:[#allocation2 + $0xb0] sm:$0xff]   ;;  %v3597_v8 = vld [vmem:[#allocation2 + $0x28] sm:$0xff]  }
  0x4a   :  { %3079 = vmatpush3.bf16.msra.mxu0 %v3591_v2  ;;  %3313 = vmatpush3.bf16.msra.mxu1 %v3592_v3  ;;  %v3598_v9 = vld [vmem:[#allocation2 + $0xa8] sm:$0xff]   ;;  %v3599_v10 = vld [vmem:[#allocation2 + $0x60] sm:$0xff]   ;;  %v3602_v13 = vld [vmem:[#allocation2 + $0x58] sm:$0xff]  }
  0x4b   :  { %3080 = vmatprep.subr.bf16.mxu0 %v3593_v4  ;;  %3314 = vmatprep.subr.bf16.mxu1 %v3910_v0  ;;  %v3600_v11 = vld [vmem:[#allocation2 + $0x20] sm:$0xff]   ;;  %v3603_v14 = vld [vmem:[#allocation2 + $0x18] sm:$0xff]   ;;  %v3605_v16 = vld [vmem:[#allocation2 + $0x50] sm:$0xff]  }
  0x4c   :  { %v3601_v12 = vld [vmem:[#allocation2 + $0xa0] sm:$0xff]   ;;  %v3604_v15 = vld [vmem:[#allocation2 + $0x98] sm:$0xff]   ;;  %v3606_v17 = vld [vmem:[#allocation2 + $0x10] sm:$0xff]  }
  0x4d   :  { %v3607_v18 = vld [vmem:[#allocation2 + $0x90] sm:$0xff]   ;;  %v3608_v19 = vld [vmem:[#allocation2 + $0x48] sm:$0xff]   ;;  %v3611_v22 = vld [vmem:[#allocation2 + $0x40] sm:$0xff]  }
  0x4e   :  { %3081 = vmatpush3.bf16.msra.mxu0 %v3594_v5  ;;  %3315 = vmatpush3.bf16.msra.mxu1 %v3595_v6  ;;  %v3609_v20 = vld [vmem:[#allocation2 + $0x8] sm:$0xff]   ;;  %v3612_v25 = vld [vmem:[#allocation2] sm:$0xff]   ;;  %v3614_v30 = vld [vmem:[#allocation2 + $0x138] sm:$0xff]  }
  0x4f   :  { %3082 = vmatprep.subr.bf16.mxu0 %v3596_v7  ;;  %3316 = vmatprep.subr.bf16.mxu1 %v3910_v0  ;;  %v3610_v21 = vld [vmem:[#allocation2 + $0x88] sm:$0xff]   ;;  %v3613_v27 = vld [vmem:[#allocation2 + $0x80] sm:$0xff]   ;;  %v3615_v34 = vld [vmem:[#allocation2 + $0xf8] sm:$0xff]  }
  0x50   :  { %v132_v23 = vld [vmem:[%s4255_s0 + $0x3] sm:$0xff]  ;;  %v133_v24 = vld [vmem:[%s4255_s0 + $0xb] sm:$0xff]  ;;  %v3616_v36 = vld [vmem:[#allocation2 + $0x178] sm:$0xff]  }
  0x51   :  { %v4038_v26 = vpack.c.bf16 %v133_v24, %v132_v23  ;;  %v134_v28 = vld [vmem:[%s4255_s0 + $0x2] sm:$0xff]  ;;  %v135_v29 = vld [vmem:[%s4255_s0 + $0xa] sm:$0xff]  ;;  %v3626_v46 = vld [vmem:[#allocation2 + $0x118] sm:$0xff]  }
  0x52   :  { %3083 = vmatpush3.bf16.msra.mxu0 %v3597_v8  ;;  %3317 = vmatpush3.bf16.msra.mxu1 %v3598_v9  ;;  %v136_v31 = vld [vmem:[%s4255_s0 + $0x4] sm:$0xff]  ;;  %v137_v32 = vld [vmem:[%s4255_s0 + $0xc] sm:$0xff]  ;;  %v138_v33 = vpack.c.bf16 %v135_v29, %v134_v28  ;;  %v3627_v47 = vld [vmem:[#allocation2 + $0xd8] sm:$0xff]  }
  0x53   :  { %3084 = vmatprep.subr.bf16.mxu0 %v3599_v10  ;;  %3318 = vmatprep.subr.bf16.mxu1 %v3910_v0  ;;  %v140_v35 = vpack.c.bf16 %v137_v32, %v136_v31  ;;  %v3617_v37 = vld [vmem:[#allocation2 + $0x130] sm:$0xff]   ;;  %v3620_v40 = vld [vmem:[#allocation2 + $0x128] sm:$0xff]   ;;  %v3623_v43 = vld [vmem:[#allocation2 + $0x120] sm:$0xff]  }
  0x54   :  { %370 = vmatprep.mubr.bf16.mxu0 %v4038_v26  ;;  %v3618_v38 = vld [vmem:[#allocation2 + $0xf0] sm:$0xff]   ;;  %v3621_v41 = vld [vmem:[#allocation2 + $0xe8] sm:$0xff]   ;;  %v3624_v44 = vld [vmem:[#allocation2 + $0xe0] sm:$0xff]  }
  0x55   :  { %v3619_v39 = vld [vmem:[#allocation2 + $0x170] sm:$0xff]   ;;  %v3622_v42 = vld [vmem:[#allocation2 + $0x168] sm:$0xff]   ;;  %v3625_v45 = vld [vmem:[#allocation2 + $0x160] sm:$0xff]  }
  0x56   :  { %3085 = vmatpush3.bf16.msra.mxu0 %v3600_v11  ;;  %3319 = vmatpush3.bf16.msra.mxu1 %v3601_v12  ;;  %v3628_v48 = vld [vmem:[#allocation2 + $0x158] sm:$0xff]   ;;  %v3629_v49 = vld [vmem:[#allocation2 + $0x110] sm:$0xff]   ;;  %v3632_v52 = vld [vmem:[#allocation2 + $0x108] sm:$0xff]  }
  0x57   :  { %3086 = vmatprep.subr.bf16.mxu0 %v3602_v13  ;;  %3320 = vmatprep.subr.bf16.mxu1 %v3910_v0  ;;  %v3630_v50 = vld [vmem:[#allocation2 + $0xd0] sm:$0xff]   ;;  %v3633_v53 = vld [vmem:[#allocation2 + $0xc8] sm:$0xff]   ;;  %v3635_v55 = vld [vmem:[#allocation2 + $0x100] sm:$0xff]  }
  0x58   :  { %v3631_v51 = vld [vmem:[#allocation2 + $0x150] sm:$0xff]   ;;  %v3634_v54 = vld [vmem:[#allocation2 + $0x148] sm:$0xff]   ;;  %v3636_v56 = vld [vmem:[#allocation2 + $0xc0] sm:$0xff]  }
  0x59   :  { %v420_v57 = vld [vmem:[%s4255_s0 + $0x1] sm:$0xff]  ;;  %v421_v58 = vld [vmem:[%s4255_s0 + $0x9] sm:$0xff]  ;;  %v3638_v60 = vld [vmem:[#allocation2 + $0x1f8] sm:$0xff]  }
  0x5a   :  { %3087 = vmatpush3.bf16.msra.mxu0 %v3603_v14  ;;  %3321 = vmatpush3.bf16.msra.mxu1 %v3604_v15  ;;  %v3637_v59 = vld [vmem:[#allocation2 + $0x140] sm:$0xff]   ;;  %v423_v62 = vld [vmem:[%s4255_s0 + $0xd] sm:$0xff]  ;;  %v424_v63 = vpack.c.bf16 %v421_v58, %v420_v57  ;;  %v3639_v1 = vld [vmem:[#allocation2 + $0x1b8] sm:$0xff]  }
  0x5b   :  { %3088 = vmatprep.subr.bf16.mxu0 %v3605_v16  ;;  %3322 = vmatprep.subr.bf16.mxu1 %v3910_v0  ;;  %v422_v61 = vld [vmem:[%s4255_s0 + $0x5] sm:$0xff]  ;;  %v3640_v3 = vld [vmem:[#allocation2 + $0x238] sm:$0xff]   ;;  %v3641_v4 = vld [vmem:[#allocation2 + $0x1f0] sm:$0xff]  }
  0x5c   :  { %v425_v2 = vpack.c.bf16 %v423_v62, %v422_v61  ;;  %v3642_v5 = vld [vmem:[#allocation2 + $0x1b0] sm:$0xff]   ;;  %v3644_v7 = vld [vmem:[#allocation2 + $0x1e8] sm:$0xff]   ;;  %v3647_v10 = vld [vmem:[#allocation2 + $0x1e0] sm:$0xff]  }
  0x5d   :  { %v3643_v6 = vld [vmem:[#allocation2 + $0x230] sm:$0xff]   ;;  %v3645_v8 = vld [vmem:[#allocation2 + $0x1a8] sm:$0xff]   ;;  %v3648_v11 = vld [vmem:[#allocation2 + $0x1a0] sm:$0xff]  }
  0x5e   :  { %3089 = vmatpush3.bf16.msra.mxu0 %v3606_v17  ;;  %3323 = vmatpush3.bf16.msra.mxu1 %v3607_v18  ;;  %v3646_v9 = vld [vmem:[#allocation2 + $0x228] sm:$0xff]   ;;  %v3649_v12 = vld [vmem:[#allocation2 + $0x220] sm:$0xff]   ;;  %v3650_v13 = vld [vmem:[#allocation2 + $0x1d8] sm:$0xff]  }
  0x5f   :  { %3090 = vmatprep.subr.bf16.mxu0 %v3608_v19  ;;  %3324 = vmatprep.subr.bf16.mxu1 %v3910_v0  ;;  %v3651_v14 = vld [vmem:[#allocation2 + $0x198] sm:$0xff]   ;;  %v3653_v16 = vld [vmem:[#allocation2 + $0x1d0] sm:$0xff]   ;;  %v3656_v19 = vld [vmem:[#allocation2 + $0x1c8] sm:$0xff]  }
  0x60   :  { %v3652_v15 = vld [vmem:[#allocation2 + $0x218] sm:$0xff]   ;;  %v3654_v17 = vld [vmem:[#allocation2 + $0x190] sm:$0xff]   ;;  %v3660_v23 = vld [vmem:[#allocation2 + $0x180] sm:$0xff]  }
  0x61   :  { %v3655_v18 = vld [vmem:[#allocation2 + $0x210] sm:$0xff]   ;;  %v706_v24 = vld [vmem:[%s4255_s0] sm:$0xff] }
  0x62   :  { %3091 = vmatpush3.bf16.msra.mxu0 %v3609_v20  ;;  %3325 = vmatpush3.bf16.msra.mxu1 %v3610_v21  ;;  %v3657_v20 = vld [vmem:[#allocation2 + $0x188] sm:$0xff]  }
  0x63   :  { %3092 = vmatprep.subr.bf16.mxu0 %v3611_v22  ;;  %3326 = vmatprep.subr.bf16.mxu1 %v3910_v0  ;;  %v3658_v21 = vld [vmem:[#allocation2 + $0x208] sm:$0xff]   ;;  %v3659_v22 = vld [vmem:[#allocation2 + $0x1c0] sm:$0xff]  }
  0x64   :  { %v709_v28 = vld [vmem:[%s4255_s0 + $0xe] sm:$0xff] }
  0x66   :  { %3093 = vmatpush3.bf16.msra.mxu0 %v3612_v25  ;;  %3327 = vmatpush3.bf16.msra.mxu1 %v3613_v27  ;;  %v707_v25 = vld [vmem:[%s4255_s0 + $0x8] sm:$0xff] }
  0x67   :  { %3109 = vmatprep.subr.bf16.mxu0 %v3614_v30  ;;  %3332 = vmatprep.subr.bf16.mxu1 %v3910_v0  ;;  %v708_v27 = vld [vmem:[%s4255_s0 + $0x6] sm:$0xff]  ;;  %v710_v29 = vpack.c.bf16 %v707_v25, %v706_v24 }
  0x68   :  { %v711_v30 = vpack.c.bf16 %v709_v28, %v708_v27 }
  0x69   :  { %371 = vmatmul.mubr.bf16.vlgmr.msra.gmra.mxu0 %v138_v33  ;;  %3329 = vmatmul.mubr.bf16.vlgmr.msra.gmra.mxu1 %v140_v35 }
  0x6a   :  { %3110 = vmatpush3.bf16.msra.mxu0 %v3615_v34  ;;  %3333 = vmatpush3.bf16.msra.mxu1 %v3616_v36  ;;  %v3662_v36 = vld [vmem:[#allocation4 + $0x38] sm:$0xff]  }
  0x6b   :  { %3111 = vmatprep.subr.bf16.mxu0 %v3617_v37  ;;  %3334 = vmatprep.subr.bf16.mxu1 %v3910_v0  ;;  %v3664_v37 = vld [vmem:[#allocation4 + $0x30] sm:$0xff]  }
  0x6c   :  { %656 = vmatprep.mubr.bf16.mxu0 %v4038_v26  ;;  %3348 = vmatprep.mubr.msk.bf16.mxu1 %vm3911_vm0, %v3910_v0 }
  0x6e   :  { %3112 = vmatpush3.bf16.msra.mxu0 %v3618_v38  ;;  %3335 = vmatpush3.bf16.msra.mxu1 %v3619_v39  ;;  %v3666_v39 = vld [vmem:[#allocation4 + $0x28] sm:$0xff]  }
  0x6f   :  { %3113 = vmatprep.subr.bf16.mxu0 %v3620_v40  ;;  %3336 = vmatprep.subr.bf16.mxu1 %v3910_v0 }
  0x72   :  { %3114 = vmatpush3.bf16.msra.mxu0 %v3621_v41  ;;  %3337 = vmatpush3.bf16.msra.mxu1 %v3622_v42  ;;  %v3668_v41 = vld [vmem:[#allocation4 + $0x20] sm:$0xff]  }
  0x73   :  { %3115 = vmatprep.subr.bf16.mxu0 %v3623_v43  ;;  %3338 = vmatprep.subr.bf16.mxu1 %v3910_v0 }
  0x76   :  { %3116 = vmatpush3.bf16.msra.mxu0 %v3624_v44  ;;  %3339 = vmatpush3.bf16.msra.mxu1 %v3625_v45  ;;  %v3670_v45 = vld [vmem:[#allocation4 + $0x18] sm:$0xff]  }
  0x77   :  { %3117 = vmatprep.subr.bf16.mxu0 %v3626_v46  ;;  %3340 = vmatprep.subr.bf16.mxu1 %v3910_v0  ;;  %v2883_v46 = vld [vmem:[%s4258_s3] ss:$0 sm:$0xff] }
  0x7a   :  { %3118 = vmatpush3.bf16.msra.mxu0 %v3627_v47  ;;  %3341 = vmatpush3.bf16.msra.mxu1 %v3628_v48 }
  0x7b   :  { %3119 = vmatprep.subr.bf16.mxu0 %v3629_v49  ;;  %3342 = vmatprep.subr.bf16.mxu1 %v3910_v0  ;;  %v2908_v49 = vld [vmem:[%s4258_s3 + $0x1] ss:$0 sm:$0xff] }
  0x7e   :  { %3120 = vmatpush3.bf16.msra.mxu0 %v3630_v50  ;;  %3343 = vmatpush3.bf16.msra.mxu1 %v3631_v51 }
  0x7f   :  { %3121 = vmatprep.subr.bf16.mxu0 %v3632_v52  ;;  %3344 = vmatprep.subr.bf16.mxu1 %v3910_v0 }
  0x82   :  { %3122 = vmatpush3.bf16.msra.mxu0 %v3633_v53  ;;  %3345 = vmatpush3.bf16.msra.mxu1 %v3634_v54 }
  0x83   :  { %3123 = vmatprep.subr.bf16.mxu0 %v3635_v55  ;;  %3346 = vmatprep.subr.bf16.mxu1 %v3910_v0  ;;  %v3672_v55 = vld [vmem:[#allocation4 + $0x10] sm:$0xff]  }
  0x86   :  { %3124 = vmatpush3.bf16.msra.mxu0 %v3636_v56  ;;  %3347 = vmatpush3.bf16.msra.mxu1 %v3637_v59 }
  0x87   :  { %3140 = vmatprep.subr.bf16.mxu0 %v3638_v60  ;;  %3352 = vmatprep.subr.bf16.mxu1 %v3910_v0 }
  0x89   :  { %657 = vmatmul.mubr.bf16.vlgmr.msra.gmra.mxu0 %v424_v63  ;;  %3349 = vmatmul.mubr.bf16.vlgmr.msra.gmra.mxu1 %v425_v2 }
  0x8a   :  { %3141 = vmatpush3.bf16.msra.mxu0 %v3639_v1  ;;  %3353 = vmatpush3.bf16.msra.mxu1 %v3640_v3  ;;  %v3674_v1 = vld [vmem:[#allocation4 + $0x8] sm:$0xff]  }
  0x8b   :  { %3142 = vmatprep.subr.bf16.mxu0 %v3641_v4  ;;  %3354 = vmatprep.subr.bf16.mxu1 %v3910_v0 }
  0x8c   :  { %942 = vmatprep.mubr.bf16.mxu0 %v4038_v26  ;;  %3368 = vmatprep.mubr.msk.bf16.mxu1 %vm3911_vm0, %v3910_v0  ;;  %v3661_v26 = vld [vmem:[#allocation2 + $0x200] sm:$0xff]  }
  0x8e   :  { %3143 = vmatpush3.bf16.msra.mxu0 %v3642_v5  ;;  %3355 = vmatpush3.bf16.msra.mxu1 %v3643_v6 }
  0x8f   :  { %3144 = vmatprep.subr.bf16.mxu0 %v3644_v7  ;;  %3356 = vmatprep.subr.bf16.mxu1 %v3910_v0 }
  0x92   :  { %3145 = vmatpush3.bf16.msra.mxu0 %v3645_v8  ;;  %3357 = vmatpush3.bf16.msra.mxu1 %v3646_v9 }
  0x93   :  { %3146 = vmatprep.subr.bf16.mxu0 %v3647_v10  ;;  %3358 = vmatprep.subr.bf16.mxu1 %v3910_v0 }
  0x96   :  { %3147 = vmatpush3.bf16.msra.mxu0 %v3648_v11  ;;  %3359 = vmatpush3.bf16.msra.mxu1 %v3649_v12 }
  0x97   :  { %3148 = vmatprep.subr.bf16.mxu0 %v3650_v13  ;;  %3360 = vmatprep.subr.bf16.mxu1 %v3910_v0 }
  0x9a   :  { %3149 = vmatpush3.bf16.msra.mxu0 %v3651_v14  ;;  %3361 = vmatpush3.bf16.msra.mxu1 %v3652_v15 }
  0x9b   :  { %3150 = vmatprep.subr.bf16.mxu0 %v3653_v16  ;;  %3362 = vmatprep.subr.bf16.mxu1 %v3910_v0 }
  0x9e   :  { %3151 = vmatpush3.bf16.msra.mxu0 %v3654_v17  ;;  %3363 = vmatpush3.bf16.msra.mxu1 %v3655_v18 }
  0x9f   :  { %3152 = vmatprep.subr.bf16.mxu0 %v3656_v19  ;;  %3364 = vmatprep.subr.bf16.mxu1 %v3910_v0 }
  0xa2   :  { %3153 = vmatpush3.bf16.msra.mxu0 %v3657_v20  ;;  %3365 = vmatpush3.bf16.msra.mxu1 %v3658_v21 }
  0xa3   :  { %3154 = vmatprep.subr.bf16.mxu0 %v3659_v22  ;;  %3366 = vmatprep.subr.bf16.mxu1 %v3910_v0 }
  0xa6   :  { %3155 = vmatpush3.bf16.msra.mxu0 %v3660_v23  ;;  %3367 = vmatpush3.bf16.msra.mxu1 %v3661_v26  ;;  %v2933_v23 = vld [vmem:[%s4258_s3 + $0x2] ss:$0 sm:$0xff] }
  0xa7   :  { %3379 = vmatprep.subr.bf16.mxu0 %v3910_v0 }
  0xa9   :  { %943 = vmatmul.mubr.bf16.vlgmr.msra.gmra.mxu0 %v710_v29  ;;  %3369 = vmatmul.mubr.bf16.vlgmr.msra.gmra.mxu1 %v711_v30 }
  0xaa   :  { %3395 = vmatprep.mubr.msk.bf16.mxu0 %vm3911_vm0, %v3910_v0  ;;  %1148 = vmatprep.mubr.f32.mxu1 %v3910_v0 }
  0xab   :  { %3380 = vmatpush3.bf16.msra.mxu0 %v3662_v36 }
  0xac   :  { %3381 = vmatprep.subr.bf16.mxu0 %v3910_v0 }
  0xaf   :  { %3382 = vmatpush3.bf16.msra.mxu0 %v3664_v37 }
  0xb0   :  { %3383 = vmatprep.subr.bf16.mxu0 %v3910_v0 }
  0xb3   :  { %3384 = vmatpush3.bf16.msra.mxu0 %v3666_v39 }
  0xb4   :  { %3385 = vmatprep.subr.bf16.mxu0 %v3910_v0 }
  0xb7   :  { %3386 = vmatpush3.bf16.msra.mxu0 %v3668_v41 }
  0xb8   :  { %3387 = vmatprep.subr.bf16.mxu0 %v3910_v0 }
  0xbb   :  { %3388 = vmatpush3.bf16.msra.mxu0 %v3670_v45 }
  0xbc   :  { %3389 = vmatprep.subr.bf16.mxu0 %v3910_v0 }
  0xbf   :  { %3390 = vmatpush3.bf16.msra.mxu0 %v3672_v55 }
  0xc0   :  { %3391 = vmatprep.subr.bf16.mxu0 %v3910_v0 }
  0xc3   :  { %3392 = vmatpush3.bf16.msra.mxu0 %v3674_v1 }
  0xc4   :  { %3393 = vmatprep.subr.bf16.mxu0 %v3910_v0 }
 0x129   :  { %v413_v31 = vpop.f32.mrf.mxu1  ;;  %v3094_v35 = vpop.f32.mrf.mxu0 }
 0x12b   :  { %v3330_v32 = vpop.f32.mrf.mxu1  ;;  %v3095_v38 = vpop.f32.mrf.mxu0 }
 0x12c   :  { %v3096_v43 = vadd.f32 %v3095_v38, %v3094_v35 }
 0x12d   :  { %v416_v33 = vpop.f32.mrf.mxu1  ;;  %v3097_v40 = vpop.f32.mrf.mxu0 }
 0x12e   :  { %v373_v51 = vadd.f32 %v3096_v43, %v2883_v46 }
 0x12f   :  { %v3331_v34 = vpop.f32.mrf.mxu1  ;;  %v3098_v42 = vpop.f32.mrf.mxu0 }
 0x130   :  { %v3099_v44 = vadd.f32 %v3098_v42, %v3097_v40  ;;  %v414_v60 = vadd.f32 %v413_v31, %v373_v51 }
 0x132   :  { %v376_v52 = vadd.f32 %v3099_v44, %v2883_v46  ;;  %v992_v4 = vmax.f32 %v414_v60, 0.0 }
 0x134   :  { %v417_v61 = vadd.f32 %v416_v33, %v376_v52 }
 0x136   :  { %v993_v5 = vmax.f32 %v417_v61, 0.0 }
 0x149   :  { %v3125_v47 = vpop.f32.mrf.mxu0  ;;  %v699_v48 = vpop.f32.mrf.mxu1 }
 0x14b   :  { %v3126_v50 = vpop.f32.mrf.mxu0  ;;  %v3350_v54 = vpop.f32.mrf.mxu1 }
 0x14c   :  { %v3127_v53 = vadd.f32 %v3126_v50, %v3125_v47 }
 0x14d   :  { %v3128_v56 = vpop.f32.mrf.mxu0  ;;  %v702_v58 = vpop.f32.mrf.mxu1 }
 0x14e   :  { %v659_v57 = vadd.f32 %v3127_v53, %v2908_v49 }
 0x14f   :  { %v3129_v59 = vpop.f32.mrf.mxu0  ;;  %v3351_v63 = vpop.f32.mrf.mxu1 }
 0x150   :  { %v3130_v62 = vadd.f32 %v3129_v59, %v3128_v56  ;;  %v700_v2 = vadd.f32 %v699_v48, %v659_v57 }
 0x152   :  { %v662_v3 = vadd.f32 %v3130_v62, %v2908_v49  ;;  %v994_v7 = vadd.f32 %v992_v4, %v700_v2  ;;  %v996_v39 = vmax.f32 %v700_v2, 0.0 }
 0x154   :  { %v703_v6 = vadd.f32 %v702_v58, %v662_v3 }
 0x156   :  { %v995_v8 = vadd.f32 %v993_v5, %v703_v6  ;;  %v997_v40 = vmax.f32 %v703_v6, 0.0 }
 0x158   :  { %v1004_v9 = vadd.f32 %v995_v8, %v994_v7 }
 0x15a   :  { %v1005_v10 = vrot.slane %v1004_v9, 4 }
 0x15c   :  { %v1006_v11 = vadd.f32 %v1005_v10, %v1004_v9 }
 0x15e   :  { %v1007_v12 = vrot.slane %v1006_v11, 2 }
 0x160   :  { %v1008_v13 = vadd.f32 %v1007_v12, %v1006_v11 }
 0x162   :  { %v1009_v14 = vrot.slane %v1008_v13, 1 }
 0x164   :  { %v1010_v15 = vadd.f32 %v1009_v14, %v1008_v13 }
 0x166   :  { %v1026_v16 = vmul.f32 0.0625, %v1010_v15 }
 0x168   :  { %v1029_v17 = vsub.f32 %v994_v7, %v1026_v16  ;;  %v1032_v18 = vsub.f32 %v995_v8, %v1026_v16 }
 0x169   :  { %v3156_v19 = vpop.f32.mrf.mxu0  ;;  %v985_v22 = vpop.f32.mrf.mxu1 }
 0x16a   :  { %v1035_v20 = vmul.f32 %v1029_v17, %v1029_v17  ;;  %v1038_v21 = vmul.f32 %v1032_v18, %v1032_v18 }
 0x16b   :  { %v3157_v24 = vpop.f32.mrf.mxu0  ;;  %v3370_v27 = vpop.f32.mrf.mxu1 }
 0x16c   :  { %v1041_v25 = vadd.f32 %v1038_v21, %v1035_v20  ;;  %v3158_v26 = vadd.f32 %v3157_v24, %v3156_v19 }
 0x16d   :  { %v3159_v28 = vpop.f32.mrf.mxu0  ;;  %v988_v31 = vpop.f32.mrf.mxu1 }
 0x16e   :  { %v1042_v29 = vrot.slane %v1041_v25, 4  ;;  %v945_v30 = vadd.f32 %v3158_v26, %v2933_v23 }
 0x16f   :  { %v3160_v32 = vpop.f32.mrf.mxu0  ;;  %v3371_v36 = vpop.f32.mrf.mxu1 }
 0x170   :  { %v1043_v33 = vadd.f32 %v1042_v29, %v1041_v25  ;;  %v986_v34 = vadd.f32 %v985_v22, %v945_v30  ;;  %v3161_v35 = vadd.f32 %v3160_v32, %v3159_v28 }
 0x172   :  { %v1044_v37 = vrot.slane %v1043_v33, 2  ;;  %v948_v38 = vadd.f32 %v3161_v35, %v2933_v23  ;;  %v1000_v42 = vmax.f32 %v986_v34, 0.0  ;;  %v998_v45 = vadd.f32 %v996_v39, %v986_v34  ;;  %v4123_v39 = vld [vmem:[%s4256_s1] sm:$0xff] }
 0x174   :  { %v1045_v41 = vadd.f32 %v1044_v37, %v1043_v33  ;;  %v989_v43 = vadd.f32 %v988_v31, %v948_v38  ;;  %v1002_v49 = vadd.f32 %v1000_v42, %v414_v60  ;;  %v4131_v42 = vld [vmem:[%s4256_s1 + $0x8] sm:$0xff] }
 0x176   :  { %v1046_v44 = vrot.slane %v1045_v41, 1  ;;  %v999_v46 = vadd.f32 %v997_v40, %v989_v43  ;;  %v1001_v47 = vmax.f32 %v989_v43, 0.0  ;;  %v3663_v43 = vld [vmem:[#allocation4 + $0x78] sm:$0xff]  }
 0x178   :  { %v1047_v48 = vadd.f32 %v1046_v44, %v1045_v41  ;;  %v1011_v50 = vadd.f32 %v999_v46, %v998_v45  ;;  %v1003_v51 = vadd.f32 %v1001_v47, %v417_v61  ;;  %v3665_v44 = vld [vmem:[#allocation4 + $0x70] sm:$0xff]   ;;  %v3671_v47 = vld [vmem:[#allocation4 + $0x58] sm:$0xff]  }
 0x17a   :  { %v1062_v52 = vmul.f32 0.0625, %v1047_v48  ;;  %v1012_v53 = vrot.slane %v1011_v50, 4  ;;  %v1018_v54 = vadd.f32 %v1003_v51, %v1002_v49  ;;  %v3673_v48 = vld [vmem:[#allocation4 + $0x50] sm:$0xff]  }
 0x17c   :  { %v1065_v55 = vadd.f32 1e-05, %v1062_v52  ;;  %v1013_v56 = vadd.f32 %v1012_v53, %v1011_v50  ;;  %v1019_v57 = vrot.slane %v1018_v54, 4  ;;  %v3676_v50 = vld [vmem:[#allocation4] sm:$0xff]   ;;  %v3686_v52 = vld [vmem:[#allocation6 + $0x78] sm:$0xff]  }
 0x17d   :  { %3394 = vmatpush3.bf16.msra.mxu0 %v3676_v50 }
 0x17e   :  { %3766 = vrsqrt.f32 %v1065_v55  ;;  %v1014_v58 = vrot.slane %v1013_v56, 2  ;;  %v1020_v59 = vadd.f32 %v1019_v57, %v1018_v54  ;;  %3419 = vmatprep.subr.bf16.mxu0 %v3910_v0 }
 0x180   :  { %v1015_v62 = vadd.f32 %v1014_v58, %v1013_v56  ;;  %v1021_v63 = vrot.slane %v1020_v59, 2  ;;  %v3678_v56 = vld [vmem:[#allocation4 + $0xb8] sm:$0xff]  }
 0x182   :  { %v1016_v1 = vrot.slane %v1015_v62, 1  ;;  %v1022_v2 = vadd.f32 %v1021_v63, %v1020_v59  ;;  %v3687_v59 = vld [vmem:[#allocation6 + $0x38] sm:$0xff]   ;;  %v3688_v63 = vld [vmem:[#allocation6 + $0x70] sm:$0xff]  }
 0x184   :  { %v1017_v3 = vadd.f32 %v1016_v1, %v1015_v62  ;;  %v1023_v4 = vrot.slane %v1022_v2, 1  ;;  %v3679_v1 = vld [vmem:[#allocation4 + $0xb0] sm:$0xff]  }
 0x186   :  { %v1027_v5 = vmul.f32 0.0625, %v1017_v3  ;;  %v1024_v6 = vadd.f32 %v1023_v4, %v1022_v2  ;;  %v3689_v2 = vld [vmem:[#allocation6 + $0x30] sm:$0xff]   ;;  %v3690_v3 = vld [vmem:[#allocation6 + $0x68] sm:$0xff]  }
 0x187   :  { %v3680_v4 = vld [vmem:[#allocation4 + $0xa8] sm:$0xff]  }
 0x188   :  { %v1030_v60 = vsub.f32 %v998_v45, %v1027_v5  ;;  %v1033_v7 = vsub.f32 %v999_v46, %v1027_v5  ;;  %v1028_v61 = vmul.f32 0.0625, %v1024_v6  ;;  %v3667_v45 = vld [vmem:[#allocation4 + $0x68] sm:$0xff]   ;;  %v3669_v46 = vld [vmem:[#allocation4 + $0x60] sm:$0xff]  }
 0x189   :  { %v3691_v5 = vld [vmem:[#allocation6 + $0x28] sm:$0xff]   ;;  %v3692_v6 = vld [vmem:[#allocation6 + $0x60] sm:$0xff]  }
 0x18a   :  { %v1036_v8 = vmul.f32 %v1030_v60, %v1030_v60  ;;  %v1039_v9 = vmul.f32 %v1033_v7, %v1033_v7  ;;  %v1031_v10 = vsub.f32 %v1002_v49, %v1028_v61  ;;  %v1034_v11 = vsub.f32 %v1003_v51, %v1028_v61  ;;  %v3675_v49 = vld [vmem:[#allocation4 + $0x48] sm:$0xff]   ;;  %v3677_v51 = vld [vmem:[#allocation4 + $0x40] sm:$0xff]   ;;  %v3694_v61 = vld [vmem:[#allocation6 + $0x58] sm:$0xff]  }
 0x18b   :  { %v3767_v12 = vpop.eup %3766 }
 0x18c   :  { %v1048_v13 = vadd.f32 %v1039_v9, %v1036_v8  ;;  %v1074_v14 = vmul.f32 %v3767_v12, %v1032_v18  ;;  %v1071_v15 = vmul.f32 %v3767_v12, %v1029_v17  ;;  %v1037_v16 = vmul.f32 %v1031_v10, %v1031_v10  ;;  %v3682_v8 = vld [vmem:[#allocation4 + $0x98] sm:$0xff]  }
 0x18d   :  { %v1040_v19 = vmul.f32 %v1034_v11, %v1034_v11  ;;  %v3695_v9 = vld [vmem:[#allocation6 + $0x18] sm:$0xff]  }
 0x18e   :  { %v1049_v20 = vrot.slane %v1048_v13, 4 }
 0x18f   :  { %v1055_v21 = vadd.f32 %v1040_v19, %v1037_v16  ;;  %v3696_v16 = vld [vmem:[#allocation6 + $0x50] sm:$0xff]  }
 0x190   :  { %v1050_v22 = vadd.f32 %v1049_v20, %v1048_v13  ;;  %v3685_v13 = vld [vmem:[#allocation4 + $0x80] sm:$0xff]   ;;  %v3697_v19 = vld [vmem:[#allocation6 + $0x10] sm:$0xff]   ;;  %v3698_v20 = vld [vmem:[#allocation6 + $0x48] sm:$0xff]  }
 0x191   :  { %v1056_v23 = vrot.slane %v1055_v21, 4 }
 0x192   :  { %v1051_v24 = vrot.slane %v1050_v22, 2 }
 0x193   :  { %v1057_v25 = vadd.f32 %v1056_v23, %v1055_v21  ;;  %v3699_v21 = vld [vmem:[#allocation6 + $0x8] sm:$0xff]   ;;  %v3701_v23 = vld [vmem:[#allocation6] sm:$0xff]  }
 0x194   :  { %v1052_v26 = vadd.f32 %v1051_v24, %v1050_v22  ;;  %v3700_v22 = vld [vmem:[#allocation6 + $0x40] sm:$0xff]   ;;  %v3702_v24 = vld [vmem:[#allocation6 + $0xb8] sm:$0xff]  }
 0x195   :  { %v1058_v27 = vrot.slane %v1057_v25, 2 }
 0x196   :  { %v1053_v28 = vrot.slane %v1052_v26, 1 }
 0x197   :  { %v1059_v29 = vadd.f32 %v1058_v27, %v1057_v25  ;;  %v3703_v25 = vld [vmem:[#allocation6 + $0xb0] sm:$0xff]   ;;  %v3705_v27 = vld [vmem:[#allocation6 + $0xa0] sm:$0xff]  }
 0x198   :  { %v1054_v30 = vadd.f32 %v1053_v28, %v1052_v26  ;;  %v3704_v26 = vld [vmem:[#allocation6 + $0xa8] sm:$0xff]   ;;  %v3706_v28 = vld [vmem:[#allocation6 + $0x98] sm:$0xff]  }
 0x199   :  { %v1060_v31 = vrot.slane %v1059_v29, 1 }
 0x19a   :  { %v1063_v32 = vmul.f32 0.0625, %v1054_v30  ;;  %v3708_v30 = vld [vmem:[#allocation6 + $0x88] sm:$0xff]  }
 0x19b   :  { %v1061_v33 = vadd.f32 %v1060_v31, %v1059_v29  ;;  %v3707_v29 = vld [vmem:[#allocation6 + $0x90] sm:$0xff]   ;;  %v3709_v31 = vld [vmem:[#allocation6 + $0x80] sm:$0xff]  }
 0x19c   :  { %v1066_v34 = vadd.f32 1e-05, %v1063_v32  ;;  %v1558_v32 = vlaneseq }
 0x19d   :  { %v1064_v35 = vmul.f32 0.0625, %v1061_v33 }
 0x19e   :  { %3768 = vrsqrt.f32 %v1066_v34  ;;  %v1559_v33 = vshrl.u32 %v1558_v32, 7 }
 0x19f   :  { %v1067_v17 = vadd.f32 1e-05, %v1064_v35 }
 0x1a0   :  { %v1564_v34 = vsub.s32 1, %v1559_v33  ;;  %v1560_v35 = vsub.s32 0, %v1559_v33 }
 0x1a1   :  { %3770 = vrsqrt.f32 %v1067_v17  ;;  %v1556_v17 = vld [vmem:[%s4260_s5] sm:$0x7] }
 0x1ab   :  { %v3769_v18 = vpop.eup %3768 }
 0x1ac   :  { %v1075_v36 = vmul.f32 %v3769_v18, %v1033_v7  ;;  %v1072_v38 = vmul.f32 %v3769_v18, %v1030_v60  ;;  %v3681_v60 = vld [vmem:[#allocation4 + $0xa0] sm:$0xff]  }
 0x1ad   :  { %v3693_v7 = vld [vmem:[#allocation6 + $0x20] sm:$0xff]  }
 0x1ae   :  { %v3771_v37 = vpop.eup %3770  ;;  %1112 = vmatprep.subr.mxu1 %v1075_v36  ;;  %v1565_v36 = vrot.slane %v1556_v17, %v1564_v34 }
 0x1af   :  { %1113 = vmatpush1.msra.mxu1 %v1074_v14  ;;  %v1076_v40 = vmul.f32 %v3771_v37, %v1034_v11  ;;  %v1073_v41 = vmul.f32 %v3771_v37, %v1031_v10  ;;  %v3683_v10 = vld [vmem:[#allocation4 + $0x90] sm:$0xff]   ;;  %v3684_v11 = vld [vmem:[#allocation4 + $0x88] sm:$0xff]   ;;  %v1561_v37 = vrot.slane %v1556_v17, %v1560_v35 }
 0x1b0   :  { %1114 = vmatprep.subr.mxu1 %v1072_v38 }
 0x1b1   :  { %1115 = vmatpush1.msra.mxu1 %v1071_v15 }
 0x1b2   :  { %2958 = vmatmul.mubr.msk.f32.vlgmr.msra.gmra.mxu1 %vm1077_vm1, %v4123_v39  ;;  %3372 = vmatprep.subr.mxu1 %v1076_v40 }
 0x1b3   :  { %3373 = vmatpush3.msra.mxu1 %v1076_v40  ;;  %1154 = vmatprep.mubr.f32.mxu1 %v3910_v0 }
 0x1b4   :  { %3374 = vmatprep.subr.mxu1 %v1073_v41 }
 0x1b5   :  { %3375 = vmatpush3.msra.mxu1 %v1073_v41 }
 0x1b6   :  { %2959 = vmatmul.mubr.msk.f32.gmra.mxu1 %vm1077_vm1, %v4131_v42  ;;  %3399 = vmatprep.subr.bf16.mxu1 %v3910_v0 }
 0x1b7   :  { %3376 = vmatprep.mubr.msk.f32.mxu1 %vm1077_vm1, %v4123_v39 }
 0x1ba   :  { %3377 = vmatmul.mubr.msk.f32.vlgmr.msra.gmra.mxu1 %vm1077_vm1, %v4131_v42 }
 0x1bb   :  { %3400 = vmatpush3.bf16.msra.mxu1 %v3663_v43  ;;  %3415 = vmatprep.mubr.msk.bf16.mxu1 %vm3911_vm0, %v3910_v0 }
 0x1bc   :  { %3401 = vmatprep.subr.bf16.mxu1 %v3910_v0 }
 0x1bf   :  { %3402 = vmatpush3.bf16.msra.mxu1 %v3665_v44 }
 0x1c0   :  { %3403 = vmatprep.subr.bf16.mxu1 %v3910_v0 }
 0x1c3   :  { %3404 = vmatpush3.bf16.msra.mxu1 %v3667_v45 }
 0x1c4   :  { %3405 = vmatprep.subr.bf16.mxu1 %v3910_v0 }
 0x1c7   :  { %3406 = vmatpush3.bf16.msra.mxu1 %v3669_v46 }
 0x1c8   :  { %3407 = vmatprep.subr.bf16.mxu1 %v3910_v0 }
 0x1cb   :  { %3408 = vmatpush3.bf16.msra.mxu1 %v3671_v47 }
 0x1cc   :  { %3409 = vmatprep.subr.bf16.mxu1 %v3910_v0 }
 0x1cf   :  { %3410 = vmatpush3.bf16.msra.mxu1 %v3673_v48 }
 0x1d0   :  { %3411 = vmatprep.subr.bf16.mxu1 %v3910_v0 }
 0x1d3   :  { %3412 = vmatpush3.bf16.msra.mxu1 %v3675_v49 }
 0x1d4   :  { %3413 = vmatprep.subr.bf16.mxu1 %v3910_v0 }
 0x1d7   :  { %3414 = vmatpush3.bf16.msra.mxu1 %v3677_v51 }
 0x1d8   :  { %3202 = vmatprep.subr.bf16.mxu1 %v3686_v52 }
 0x272   :  { %v1150_v53 = vpop.f32.mrf.mxu1 }
 0x274   :  { %v1152_v54 = vpop.f32.mrf.mxu1 }
 0x276   :  { %v1156_v55 = vpop.f32.mrf.mxu1 }
 0x277   :  { %v1236_v57 = vpack.c.bf16 %v1156_v55, %v1150_v53 }
 0x278   :  { %v1158_v58 = vpop.f32.mrf.mxu1 }
 0x279   :  { %v1237_v62 = vpack.c.bf16 %v1158_v58, %v1152_v54  ;;  %3396 = vmatmul.mubr.bf16.vlgmr.msra.gmra.mxu0 %v1236_v57  ;;  %v1568_v57 = vsub.s32 2, %v1559_v33 }
 0x27a   :  { %3420 = vmatpush3.bf16.msra.mxu0 %v3678_v56  ;;  %3435 = vmatprep.mubr.msk.bf16.mxu0 %vm3911_vm0, %v3910_v0  ;;  %v3378_v12 = vpop.f32.mrf.mxu1 }
 0x27b   :  { %3416 = vmatmul.mubr.bf16.vlgmr.msra.gmra.mxu1 %v1237_v62  ;;  %3421 = vmatprep.subr.bf16.mxu0 %v3910_v0  ;;  %v1569_v58 = vrot.slane %v1556_v17, %v1568_v57  ;;  %v3718_v57 = vld [vmem:[#allocation7 + $0x78] sm:$0xff]  }
 0x27c   :  { %3203 = vmatpush3.bf16.msra.mxu1 %v3687_v59  ;;  %v1227_v14 = vpop.f32.mrf.mxu1 }
 0x27d   :  { %3204 = vmatprep.subr.bf16.mxu1 %v3688_v63  ;;  %v1238_v15 = vpack.c.bf16 %v3378_v12, %v1227_v14 }
 0x27e   :  { %3422 = vmatpush3.bf16.msra.mxu0 %v3679_v1 }
 0x27f   :  { %3423 = vmatprep.subr.bf16.mxu0 %v3910_v0 }
 0x280   :  { %3205 = vmatpush3.bf16.msra.mxu1 %v3689_v2 }
 0x281   :  { %3206 = vmatprep.subr.bf16.mxu1 %v3690_v3 }
 0x282   :  { %3424 = vmatpush3.bf16.msra.mxu0 %v3680_v4 }
 0x283   :  { %3425 = vmatprep.subr.bf16.mxu0 %v3910_v0 }
 0x284   :  { %3207 = vmatpush3.bf16.msra.mxu1 %v3691_v5 }
 0x285   :  { %3208 = vmatprep.subr.bf16.mxu1 %v3692_v6 }
 0x286   :  { %3426 = vmatpush3.bf16.msra.mxu0 %v3681_v60 }
 0x287   :  { %3427 = vmatprep.subr.bf16.mxu0 %v3910_v0 }
 0x288   :  { %3209 = vmatpush3.bf16.msra.mxu1 %v3693_v7 }
 0x289   :  { %3210 = vmatprep.subr.bf16.mxu1 %v3694_v61 }
 0x28a   :  { %3428 = vmatpush3.bf16.msra.mxu0 %v3682_v8 }
 0x28b   :  { %3429 = vmatprep.subr.bf16.mxu0 %v3910_v0 }
 0x28c   :  { %3211 = vmatpush3.bf16.msra.mxu1 %v3695_v9 }
 0x28d   :  { %3212 = vmatprep.subr.bf16.mxu1 %v3696_v16 }
 0x28e   :  { %3430 = vmatpush3.bf16.msra.mxu0 %v3683_v10 }
 0x28f   :  { %3431 = vmatprep.subr.bf16.mxu0 %v3910_v0 }
 0x290   :  { %3213 = vmatpush3.bf16.msra.mxu1 %v3697_v19 }
 0x291   :  { %3214 = vmatprep.subr.bf16.mxu1 %v3698_v20 }
 0x292   :  { %3432 = vmatpush3.bf16.msra.mxu0 %v3684_v11  ;;  %v2986_v11 = vld [vmem:[%s4262_s7] ss:$0 sm:$0xff] }
 0x293   :  { %3433 = vmatprep.subr.bf16.mxu0 %v3910_v0 }
 0x294   :  { %3215 = vmatpush3.bf16.msra.mxu1 %v3699_v21 }
 0x295   :  { %3216 = vmatprep.subr.bf16.mxu1 %v3700_v22 }
 0x296   :  { %3434 = vmatpush3.bf16.msra.mxu0 %v3685_v13 }
 0x297   :  { %3439 = vmatprep.subr.bf16.mxu0 %v3910_v0 }
 0x298   :  { %3217 = vmatpush3.bf16.msra.mxu1 %v3701_v23 }
 0x299   :  { %3436 = vmatmul.mubr.bf16.vlgmr.msra.gmra.mxu0 %v1238_v15 }
 0x29a   :  { %3455 = vmatprep.mubr.msk.bf16.mxu0 %vm3911_vm0, %v3910_v0  ;;  %3440 = vmatpush3.bf16.msra.mxu0 %v3702_v24 }
 0x29b   :  { %3441 = vmatprep.subr.bf16.mxu0 %v3910_v0 }
 0x29e   :  { %3442 = vmatpush3.bf16.msra.mxu0 %v3703_v25 }
 0x29f   :  { %3443 = vmatprep.subr.bf16.mxu0 %v3910_v0 }
 0x2a2   :  { %3444 = vmatpush3.bf16.msra.mxu0 %v3704_v26 }
 0x2a3   :  { %3445 = vmatprep.subr.bf16.mxu0 %v3910_v0 }
 0x2a6   :  { %3446 = vmatpush3.bf16.msra.mxu0 %v3705_v27 }
 0x2a7   :  { %3447 = vmatprep.subr.bf16.mxu0 %v3910_v0 }
 0x2aa   :  { %3448 = vmatpush3.bf16.msra.mxu0 %v3706_v28 }
 0x2ab   :  { %3449 = vmatprep.subr.bf16.mxu0 %v3910_v0 }
 0x2ae   :  { %3450 = vmatpush3.bf16.msra.mxu0 %v3707_v29 }
 0x2af   :  { %3451 = vmatprep.subr.bf16.mxu0 %v3910_v0 }
 0x2b2   :  { %3452 = vmatpush3.bf16.msra.mxu0 %v3708_v30 }
 0x2b3   :  { %3453 = vmatprep.subr.bf16.mxu0 %v3910_v0 }
 0x2b6   :  { %3454 = vmatpush3.bf16.msra.mxu0 %v3709_v31 }
 0x2b7   :  { %3493 = vmatprep.subr.bf16.mxu0 %v3910_v0 }
 0x339   :  { %v1337_v18 = vpop.f32.mrf.mxu0 }
 0x33a   :  { %v1573_v46 = vadd.f32 %v1561_v37, %v1337_v18 }
 0x33b   :  { %v3397_v38 = vpop.f32.mrf.mxu0  ;;  %v1443_v40 = vpop.f32.mrf.mxu1 }
 0x33c   :  { %v1574_v44 = vadd.f32 %v1565_v36, %v1443_v40  ;;  %v1579_v54 = vmax.f32 %v1573_v46, 0.0  ;;  %v3710_v46 = vld [vmem:[#allocation7 + $0x38] sm:$0xff]  }
 0x33d   :  { %v1340_v41 = vpop.f32.mrf.mxu0  ;;  %v3417_v43 = vpop.f32.mrf.mxu1 }
 0x33e   :  { %v1576_v45 = vadd.f32 %v1561_v37, %v1340_v41  ;;  %v1580_v52 = vmax.f32 %v1574_v44, 0.0 }
 0x33f   :  { %v3398_v47 = vpop.f32.mrf.mxu0  ;;  %v1446_v48 = vpop.f32.mrf.mxu1 }
 0x340   :  { %v1577_v49 = vadd.f32 %v1565_v36, %v1446_v48  ;;  %v1582_v50 = vmax.f32 %v1576_v45, 0.0  ;;  %v3711_v47 = vld [vmem:[#allocation7 + $0x30] sm:$0xff]   ;;  %v3712_v48 = vld [vmem:[#allocation7 + $0x28] sm:$0xff]  }
 0x341   :  { %v3418_v51 = vpop.f32.mrf.mxu1 }
 0x342   :  { %v1583_v53 = vmax.f32 %v1577_v49, 0.0  ;;  %v1585_v56 = vpack.c.bf16 %v1582_v50, %v1579_v54  ;;  %v3713_v49 = vld [vmem:[#allocation7 + $0x20] sm:$0xff]   ;;  %v3714_v50 = vld [vmem:[#allocation7 + $0x18] sm:$0xff]   ;;  %v3715_v51 = vld [vmem:[#allocation7 + $0x10] sm:$0xff]  }
 0x344   :  { %v1586_v55 = vpack.c.bf16 %v1583_v53, %v1580_v52  ;;  %v3716_v52 = vld [vmem:[#allocation7 + $0x8] sm:$0xff]   ;;  %v3717_v53 = vld [vmem:[#allocation7] sm:$0xff]  }
 0x346   :  { %1819 = vmatprep.mubr.bf16.mxu1 %v1586_v55 }
 0x347   :  { %1820 = vmatmul.mubr.bf16.vlgmr.msra.gmra.mxu1 %v1585_v56 }
 0x348   :  { %3463 = vmatprep.mubr.msk.f32.mxu1 %vm1077_vm1, %v4123_v39 }
 0x359   :  { %v1549_v59 = vpop.f32.mrf.mxu0 }
 0x35a   :  { %v1575_v63 = vadd.f32 %v1569_v58, %v1549_v59  ;;  %v3720_v59 = vld [vmem:[#allocation7 + $0x68] sm:$0xff]  }
 0x35b   :  { %v3437_v62 = vpop.f32.mrf.mxu0 }
 0x35c   :  { %v1581_v4 = vmax.f32 %v1575_v63, 0.0  ;;  %v3721_v62 = vld [vmem:[#allocation7 + $0x60] sm:$0xff]   ;;  %v3722_v63 = vld [vmem:[#allocation7 + $0x58] sm:$0xff]  }
 0x35d   :  { %v1552_v1 = vpop.f32.mrf.mxu0 }
 0x35e   :  { %v1578_v2 = vadd.f32 %v1569_v58, %v1552_v1  ;;  %v3719_v58 = vld [vmem:[#allocation7 + $0x70] sm:$0xff]  }
 0x35f   :  { %v3438_v3 = vpop.f32.mrf.mxu0  ;;  %v3723_v1 = vld [vmem:[#allocation7 + $0x50] sm:$0xff]  }
 0x360   :  { %v1584_v5 = vmax.f32 %v1578_v2, 0.0  ;;  %v3724_v2 = vld [vmem:[#allocation7 + $0x48] sm:$0xff]   ;;  %v3013_v3 = vld [vmem:[%s4264_s9] ss:$0 sm:$0xff] }
 0x362   :  { %v1587_v6 = vpack.c.bf16 %v1584_v5, %v1581_v4 }
 0x364   :  { %3456 = vmatmul.mubr.bf16.vlgmr.msra.gmra.mxu0 %v1587_v6 }
 0x365   :  { %3509 = vmatprep.mubr.msk.bf16.mxu0 %vm3911_vm0, %v3910_v0  ;;  %3494 = vmatpush3.bf16.msra.mxu0 %v3718_v57 }
 0x366   :  { %3495 = vmatprep.subr.bf16.mxu0 %v3910_v0 }
 0x369   :  { %3496 = vmatpush3.bf16.msra.mxu0 %v3719_v58 }
 0x36a   :  { %3497 = vmatprep.subr.bf16.mxu0 %v3910_v0 }
 0x36d   :  { %3498 = vmatpush3.bf16.msra.mxu0 %v3720_v59  ;;  %v3746_v59 = vld [vmem:[#allocation7 + $0x98] sm:$0xff]  }
 0x36e   :  { %3499 = vmatprep.subr.bf16.mxu0 %v3910_v0 }
 0x371   :  { %3500 = vmatpush3.bf16.msra.mxu0 %v3721_v62  ;;  %v3747_v62 = vld [vmem:[#allocation7 + $0x90] sm:$0xff]  }
 0x372   :  { %3501 = vmatprep.subr.bf16.mxu0 %v3910_v0 }
 0x375   :  { %3502 = vmatpush3.bf16.msra.mxu0 %v3722_v63  ;;  %v3748_v63 = vld [vmem:[#allocation7 + $0x88] sm:$0xff]  }
 0x376   :  { %3503 = vmatprep.subr.bf16.mxu0 %v3910_v0 }
 0x379   :  { %3504 = vmatpush3.bf16.msra.mxu0 %v3723_v1  ;;  %v3749_v1 = vld [vmem:[#allocation7 + $0x80] sm:$0xff]  }
 0x37a   :  { %3505 = vmatprep.subr.bf16.mxu0 %v3910_v0 }
 0x37d   :  { %3506 = vmatpush3.bf16.msra.mxu0 %v3724_v2 }
 0x37e   :  { %3507 = vmatprep.subr.bf16.mxu0 %v3910_v0 }
 0x407   :  { %v3218_v60 = vpop.f32.mrf.mxu1 }
 0x409   :  { %v3219_v7 = vpop.f32.mrf.mxu1 }
 0x40a   :  { %v3220_v9 = vadd.f32 %v3219_v7, %v3218_v60 }
 0x40b   :  { %v3221_v61 = vpop.f32.mrf.mxu1 }
 0x40c   :  { %v1822_v14 = vadd.f32 %v3220_v9, %v2986_v11 }
 0x40d   :  { %v3222_v8 = vpop.f32.mrf.mxu1 }
 0x40e   :  { %v3223_v10 = vadd.f32 %v3222_v8, %v3221_v61 }
 0x410   :  { %v1825_v15 = vadd.f32 %v3223_v10, %v2986_v11  ;;  %v3725_v11 = vld [vmem:[#allocation7 + $0x40] sm:$0xff]  }
 0x411   :  { %3508 = vmatpush3.bf16.msra.mxu0 %v3725_v11  ;;  %v3753_v11 = vld [vmem:[#allocation9 + $0xa0] sm:$0xff]  }
 0x424   :  { %v1862_v12 = vpop.f32.mrf.mxu0 }
 0x425   :  { %v1863_v19 = vadd.f32 %v1862_v12, %v1822_v14  ;;  %v3726_v12 = vld [vmem:[#allocation9 + $0x78] sm:$0xff]  }
 0x426   :  { %v3457_v13 = vpop.f32.mrf.mxu0  ;;  %3272 = vmatprep.subr.bf16.mxu0 %v3726_v12  ;;  %v3754_v12 = vld [vmem:[#allocation9 + $0x98] sm:$0xff]  }
 0x428   :  { %v1865_v16 = vpop.f32.mrf.mxu0 }
 0x429   :  { %v1866_v20 = vadd.f32 %v1865_v16, %v1825_v15  ;;  %v3727_v15 = vld [vmem:[#allocation9 + $0x38] sm:$0xff]  }
 0x42a   :  { %v3458_v21 = vpop.f32.mrf.mxu0 }
 0x42b   :  { %v1869_v22 = vadd.f32 %v1866_v20, %v1863_v19  ;;  %v3730_v21 = vld [vmem:[#allocation9 + $0x68] sm:$0xff]  }
 0x42d   :  { %v1870_v23 = vrot.slane %v1869_v22, 4 }
 0x42f   :  { %v1871_v24 = vadd.f32 %v1870_v23, %v1869_v22  ;;  %v3731_v22 = vld [vmem:[#allocation9 + $0x28] sm:$0xff]   ;;  %v3732_v23 = vld [vmem:[#allocation9 + $0x60] sm:$0xff]  }
 0x431   :  { %v1872_v25 = vrot.slane %v1871_v24, 2 }
 0x433   :  { %v1873_v26 = vadd.f32 %v1872_v25, %v1871_v24  ;;  %v3734_v24 = vld [vmem:[#allocation9 + $0x58] sm:$0xff]  }
 0x434   :  { %v3735_v25 = vld [vmem:[#allocation9 + $0x18] sm:$0xff]  }
 0x435   :  { %v1874_v27 = vrot.slane %v1873_v26, 1 }
 0x437   :  { %v1875_v28 = vadd.f32 %v1874_v27, %v1873_v26  ;;  %v3736_v26 = vld [vmem:[#allocation9 + $0x50] sm:$0xff]  }
 0x438   :  { %v3737_v27 = vld [vmem:[#allocation9 + $0x10] sm:$0xff]  }
 0x439   :  { %v1876_v29 = vmul.f32 0.0625, %v1875_v28  ;;  %v3738_v28 = vld [vmem:[#allocation9 + $0x48] sm:$0xff]  }
 0x43b   :  { %v1877_v30 = vsub.f32 %v1863_v19, %v1876_v29  ;;  %v1878_v31 = vsub.f32 %v1866_v20, %v1876_v29  ;;  %v3728_v19 = vld [vmem:[#allocation9 + $0x70] sm:$0xff]   ;;  %v3739_v29 = vld [vmem:[#allocation9 + $0x8] sm:$0xff]  }
 0x43c   :  { %v3729_v20 = vld [vmem:[#allocation9 + $0x30] sm:$0xff]  }
 0x43d   :  { %v1879_v32 = vmul.f32 %v1877_v30, %v1877_v30  ;;  %v1880_v33 = vmul.f32 %v1878_v31, %v1878_v31 }
 0x43f   :  { %v1881_v34 = vadd.f32 %v1880_v33, %v1879_v32  ;;  %v3024_v33 = vld [vmem:[%s4264_s9 + $0x1] ss:$0 sm:$0xff] }
 0x441   :  { %v1882_v35 = vrot.slane %v1881_v34, 4 }
 0x443   :  { %v1883_v17 = vadd.f32 %v1882_v35, %v1881_v34 }
 0x445   :  { %v1884_v18 = vrot.slane %v1883_v17, 2 }
 0x447   :  { %v1885_v36 = vadd.f32 %v1884_v18, %v1883_v17 }
 0x449   :  { %v1886_v37 = vrot.slane %v1885_v36, 1 }
 0x44b   :  { %v1887_v38 = vadd.f32 %v1886_v37, %v1885_v36 }
 0x44d   :  { %v1888_v40 = vmul.f32 0.0625, %v1887_v38 }
 0x44f   :  { %v1889_v41 = vadd.f32 1e-05, %v1888_v40 }
 0x451   :  { %3772 = vrsqrt.f32 %v1889_v41 }
 0x45e   :  { %v3773_v43 = vpop.eup %3772 }
 0x45f   :  { %v1892_v44 = vmul.f32 %v3773_v43, %v1878_v31  ;;  %v1891_v45 = vmul.f32 %v3773_v43, %v1877_v30  ;;  %v3740_v30 = vld [vmem:[#allocation9 + $0x40] sm:$0xff]  }
 0x460   :  { %v3741_v31 = vld [vmem:[#allocation9] sm:$0xff]  }
 0x461   :  { %3459 = vmatprep.subr.mxu1 %v1892_v44 }
 0x462   :  { %3460 = vmatpush3.msra.mxu1 %v1892_v44 }
 0x463   :  { %3461 = vmatprep.subr.mxu1 %v1891_v45 }
 0x464   :  { %3462 = vmatpush3.msra.mxu1 %v1891_v45  ;;  %v3742_v45 = vld [vmem:[#allocation7 + $0xb8] sm:$0xff]  }
 0x465   :  { %3464 = vmatmul.mubr.msk.f32.vlgmr.msra.gmra.mxu1 %vm1077_vm1, %v4131_v42  ;;  %3466 = vmatprep.subr.bf16.mxu1 %v3910_v0 }
 0x466   :  { %3467 = vmatpush3.bf16.msra.mxu1 %v3710_v46  ;;  %3482 = vmatprep.mubr.msk.bf16.mxu1 %vm3911_vm0, %v3910_v0 }
 0x467   :  { %3468 = vmatprep.subr.bf16.mxu1 %v3910_v0 }
 0x46a   :  { %3469 = vmatpush3.bf16.msra.mxu1 %v3711_v47 }
 0x46b   :  { %3470 = vmatprep.subr.bf16.mxu1 %v3910_v0 }
 0x46e   :  { %3471 = vmatpush3.bf16.msra.mxu1 %v3712_v48 }
 0x46f   :  { %3472 = vmatprep.subr.bf16.mxu1 %v3910_v0 }
 0x472   :  { %3473 = vmatpush3.bf16.msra.mxu1 %v3713_v49  ;;  %v3743_v49 = vld [vmem:[#allocation7 + $0xb0] sm:$0xff]  }
 0x473   :  { %3474 = vmatprep.subr.bf16.mxu1 %v3910_v0 }
 0x476   :  { %3475 = vmatpush3.bf16.msra.mxu1 %v3714_v50 }
 0x477   :  { %3476 = vmatprep.subr.bf16.mxu1 %v3910_v0 }
 0x47a   :  { %3477 = vmatpush3.bf16.msra.mxu1 %v3715_v51 }
 0x47b   :  { %3478 = vmatprep.subr.bf16.mxu1 %v3910_v0 }
 0x47e   :  { %3479 = vmatpush3.bf16.msra.mxu1 %v3716_v52 }
 0x47f   :  { %3480 = vmatprep.subr.bf16.mxu1 %v3910_v0 }
 0x482   :  { %3481 = vmatpush3.bf16.msra.mxu1 %v3717_v53  ;;  %v3744_v53 = vld [vmem:[#allocation7 + $0xa8] sm:$0xff]  }
 0x525   :  { %v3465_v54 = vpop.f32.mrf.mxu1 }
 0x527   :  { %v1976_v55 = vpop.f32.mrf.mxu1 }
 0x528   :  { %v1985_v56 = vpack.c.bf16 %v3465_v54, %v1976_v55 }
 0x52a   :  { %3483 = vmatmul.mubr.bf16.vlgmr.msra.gmra.mxu1 %v1985_v56 }
 0x52b   :  { %3490 = vmatprep.mubr.msk.f32.mxu1 %vm1077_vm1, %v4123_v39 }
 0x5ea   :  { %v2072_v4 = vpop.f32.mrf.mxu1 }
 0x5eb   :  { %v2073_v6 = vadd.f32 %v3013_v3, %v2072_v4  ;;  %v3750_v4 = vld [vmem:[#allocation9 + $0xb8] sm:$0xff]  }
 0x5ec   :  { %v3484_v5 = vpop.f32.mrf.mxu1 }
 0x5ed   :  { %v2079_v8 = vmax.f32 %v2073_v6, 0.0  ;;  %v3751_v6 = vld [vmem:[#allocation9 + $0xb0] sm:$0xff]  }
 0x5ee   :  { %v2075_v60 = vpop.f32.mrf.mxu1 }
 0x5ef   :  { %v2076_v7 = vadd.f32 %v3013_v3, %v2075_v60 }
 0x5f0   :  { %v3485_v61 = vpop.f32.mrf.mxu1 }
 0x5f1   :  { %v2080_v9 = vmax.f32 %v2076_v7, 0.0 }
 0x5f3   :  { %v2459_v10 = vadd.f32 %v2080_v9, %v2079_v8  ;;  %3486 = vmatprep.subr.mxu1 %v2080_v9 }
 0x5f4   :  { %3487 = vmatpush3.msra.mxu1 %v2080_v9 }
 0x5f5   :  { %3488 = vmatprep.subr.mxu1 %v2079_v8  ;;  %v2460_v32 = vrot.slane %v2459_v10, 4 }
 0x5f6   :  { %3489 = vmatpush3.msra.mxu1 %v2079_v8 }
 0x5f7   :  { %3491 = vmatmul.mubr.msk.f32.vlgmr.msra.gmra.mxu1 %vm1077_vm1, %v4131_v42  ;;  %v2461_v18 = vadd.f32 %v2460_v32, %v2459_v10  ;;  %v3752_v10 = vld [vmem:[#allocation9 + $0xa8] sm:$0xff]  }
 0x5f8   :  { %3517 = vmatprep.mubr.msk.f32.mxu1 %vm1077_vm1, %v4123_v39  ;;  %v3733_v39 = vld [vmem:[#allocation9 + $0x20] sm:$0xff]  }
 0x5f9   :  { %v2462_v43 = vrot.slane %v2461_v18, 2 }
 0x5fb   :  { %v2463_v47 = vadd.f32 %v2462_v43, %v2461_v18 }
 0x5fd   :  { %v2464_v51 = vrot.slane %v2463_v47, 1 }
 0x5ff   :  { %v2465_v55 = vadd.f32 %v2464_v51, %v2463_v47 }
 0x601   :  { %v2480_v58 = vpack.c.bf16 %v2465_v55, %v2465_v55 }
 0x6b7   :  { %v3492_v13 = vpop.f32.mrf.mxu1 }
 0x6b9   :  { %v2165_v14 = vpop.f32.mrf.mxu1 }
 0x6ba   :  { %v2174_v16 = vpack.c.bf16 %v3492_v13, %v2165_v14  ;;  %v3755_v13 = vld [vmem:[#allocation9 + $0x90] sm:$0xff]   ;;  %v3756_v14 = vld [vmem:[#allocation9 + $0x88] sm:$0xff]  }
 0x6bc   :  { %3510 = vmatmul.mubr.bf16.vlgmr.msra.gmra.mxu0 %v2174_v16  ;;  %v3758_v16 = vld [vmem:[#allocation10 + $0x38] sm:$0xff]  }
 0x6bd   :  { %3273 = vmatpush3.bf16.msra.mxu0 %v3727_v15  ;;  %v3757_v15 = vld [vmem:[#allocation9 + $0x80] sm:$0xff]  }
 0x6be   :  { %3274 = vmatprep.subr.bf16.mxu0 %v3728_v19  ;;  %v3759_v19 = vld [vmem:[#allocation10 + $0x30] sm:$0xff]  }
 0x6c1   :  { %3275 = vmatpush3.bf16.msra.mxu0 %v3729_v20  ;;  %v3760_v20 = vld [vmem:[#allocation10 + $0x28] sm:$0xff]  }
 0x6c2   :  { %3276 = vmatprep.subr.bf16.mxu0 %v3730_v21  ;;  %v3761_v21 = vld [vmem:[#allocation10 + $0x20] sm:$0xff]  }
 0x6c5   :  { %3277 = vmatpush3.bf16.msra.mxu0 %v3731_v22  ;;  %v3762_v22 = vld [vmem:[#allocation10 + $0x18] sm:$0xff]  }
 0x6c6   :  { %3278 = vmatprep.subr.bf16.mxu0 %v3732_v23  ;;  %v3763_v23 = vld [vmem:[#allocation10 + $0x10] sm:$0xff]  }
 0x6c9   :  { %3279 = vmatpush3.bf16.msra.mxu0 %v3733_v39  ;;  %v3764_v39 = vld [vmem:[#allocation10 + $0x8] sm:$0xff]  }
 0x6ca   :  { %3280 = vmatprep.subr.bf16.mxu0 %v3734_v24  ;;  %v3035_v24 = vld [vmem:[%s4264_s9 + $0x2] ss:$0 sm:$0xff] }
 0x6cd   :  { %3281 = vmatpush3.bf16.msra.mxu0 %v3735_v25 }
 0x6ce   :  { %3282 = vmatprep.subr.bf16.mxu0 %v3736_v26 }
 0x6d1   :  { %3283 = vmatpush3.bf16.msra.mxu0 %v3737_v27 }
 0x6d2   :  { %3284 = vmatprep.subr.bf16.mxu0 %v3738_v28 }
 0x6d5   :  { %3285 = vmatpush3.bf16.msra.mxu0 %v3739_v29 }
 0x6d6   :  { %3286 = vmatprep.subr.bf16.mxu0 %v3740_v30 }
 0x6d9   :  { %3287 = vmatpush3.bf16.msra.mxu0 %v3741_v31 }
 0x6da   :  { %3560 = vmatprep.subr.bf16.mxu0 %v3910_v0 }
 0x77c   :  { %v2261_v34 = vpop.f32.mrf.mxu0 }
 0x77d   :  { %v2262_v17 = vadd.f32 %v3024_v33, %v2261_v34 }
 0x77e   :  { %v3511_v35 = vpop.f32.mrf.mxu0 }
 0x77f   :  { %v2268_v40 = vmax.f32 %v2262_v17, 0.0 }
 0x780   :  { %v2264_v36 = vpop.f32.mrf.mxu0 }
 0x781   :  { %v2265_v37 = vadd.f32 %v3024_v33, %v2264_v36 }
 0x782   :  { %v3512_v38 = vpop.f32.mrf.mxu0 }
 0x783   :  { %v2269_v41 = vmax.f32 %v2265_v37, 0.0  ;;  %v3765_v38 = vld [vmem:[#allocation10] sm:$0xff]  }
 0x785   :  { %v2466_v44 = vadd.f32 %v2269_v41, %v2268_v40  ;;  %3513 = vmatprep.subr.mxu1 %v2269_v41 }
 0x786   :  { %3514 = vmatpush3.msra.mxu1 %v2269_v41 }
 0x787   :  { %v2467_v46 = vrot.slane %v2466_v44, 4  ;;  %3515 = vmatprep.subr.mxu1 %v2268_v40 }
 0x788   :  { %3516 = vmatpush3.msra.mxu1 %v2268_v40  ;;  %v3044_v40 = vld [vmem:[%s4266_s11] ss:$0 sm:$0xff] }
 0x789   :  { %v2468_v48 = vadd.f32 %v2467_v46, %v2466_v44  ;;  %3518 = vmatmul.mubr.msk.f32.vlgmr.msra.gmra.mxu1 %vm1077_vm1, %v4131_v42  ;;  %3520 = vmatprep.subr.bf16.mxu1 %v3910_v0  ;;  %v3745_v42 = vld [vmem:[#allocation7 + $0xa0] sm:$0xff]  }
 0x78a   :  { %3521 = vmatpush3.bf16.msra.mxu1 %v3742_v45  ;;  %3536 = vmatprep.mubr.msk.bf16.mxu1 %vm3911_vm0, %v3910_v0 }
 0x78b   :  { %v2469_v50 = vrot.slane %v2468_v48, 2  ;;  %3522 = vmatprep.subr.bf16.mxu1 %v3910_v0 }
 0x78d   :  { %v2470_v52 = vadd.f32 %v2469_v50, %v2468_v48 }
 0x78e   :  { %3523 = vmatpush3.bf16.msra.mxu1 %v3743_v49  ;;  %v3069_v49 = vld [vmem:[%s4268_s13] ss:$0 sm:$0xff] }
 0x78f   :  { %v2471_v54 = vrot.slane %v2470_v52, 1  ;;  %3524 = vmatprep.subr.bf16.mxu1 %v3910_v0 }
 0x791   :  { %v2472_v56 = vadd.f32 %v2471_v54, %v2470_v52 }
 0x792   :  { %3525 = vmatpush3.bf16.msra.mxu1 %v3744_v53 }
 0x793   :  { %v2481_v57 = vpack.c.bf16 %v2472_v56, %v2472_v56  ;;  %3526 = vmatprep.subr.bf16.mxu1 %v3910_v0 }
 0x795   :  { %2714 = vmatprep.mubr.bf16.mxu0 %v2481_v57 }
 0x796   :  { %2715 = vmatmul.mubr.bf16.vlgmr.msra.gmra.mxu0 %v2480_v58  ;;  %3527 = vmatpush3.bf16.msra.mxu1 %v3745_v42 }
 0x797   :  { %3528 = vmatprep.subr.bf16.mxu1 %v3910_v0  ;;  %3576 = vmatprep.mubr.msk.bf16.mxu0 %vm3911_vm0, %v3910_v0 }
 0x798   :  { %3561 = vmatpush3.bf16.msra.mxu0 %v3758_v16 }
 0x799   :  { %3562 = vmatprep.subr.bf16.mxu0 %v3910_v0 }
 0x79a   :  { %3529 = vmatpush3.bf16.msra.mxu1 %v3746_v59 }
 0x79b   :  { %3530 = vmatprep.subr.bf16.mxu1 %v3910_v0 }
 0x79c   :  { %3563 = vmatpush3.bf16.msra.mxu0 %v3759_v19 }
 0x79d   :  { %3564 = vmatprep.subr.bf16.mxu0 %v3910_v0 }
 0x79e   :  { %3531 = vmatpush3.bf16.msra.mxu1 %v3747_v62 }
 0x79f   :  { %3532 = vmatprep.subr.bf16.mxu1 %v3910_v0 }
 0x7a0   :  { %3565 = vmatpush3.bf16.msra.mxu0 %v3760_v20 }
 0x7a1   :  { %3566 = vmatprep.subr.bf16.mxu0 %v3910_v0 }
 0x7a2   :  { %3533 = vmatpush3.bf16.msra.mxu1 %v3748_v63 }
 0x7a3   :  { %3534 = vmatprep.subr.bf16.mxu1 %v3910_v0 }
 0x7a4   :  { %3567 = vmatpush3.bf16.msra.mxu0 %v3761_v21 }
 0x7a5   :  { %3568 = vmatprep.subr.bf16.mxu0 %v3910_v0 }
 0x7a6   :  { %3535 = vmatpush3.bf16.msra.mxu1 %v3749_v1 }
 0x7a7   :  { %3540 = vmatprep.subr.bf16.mxu1 %v3910_v0 }
 0x7a8   :  { %3569 = vmatpush3.bf16.msra.mxu0 %v3762_v22 }
 0x7a9   :  { %3570 = vmatprep.subr.bf16.mxu0 %v3910_v0 }
 0x7ac   :  { %3571 = vmatpush3.bf16.msra.mxu0 %v3763_v23 }
 0x7ad   :  { %3572 = vmatprep.subr.bf16.mxu0 %v3910_v0 }
 0x7b0   :  { %3573 = vmatpush3.bf16.msra.mxu0 %v3764_v39 }
 0x7b1   :  { %3574 = vmatprep.subr.bf16.mxu0 %v3910_v0 }
 0x7b4   :  { %3575 = vmatpush3.bf16.msra.mxu0 %v3765_v38 }
 0x849   :  { %v3519_v2 = vpop.f32.mrf.mxu1 }
 0x84b   :  { %v2354_v3 = vpop.f32.mrf.mxu1 }
 0x84c   :  { %v2363_v5 = vpack.c.bf16 %v3519_v2, %v2354_v3 }
 0x84e   :  { %3537 = vmatmul.mubr.bf16.vlgmr.msra.gmra.mxu1 %v2363_v5 }
 0x84f   :  { %3541 = vmatpush3.bf16.msra.mxu1 %v3750_v4  ;;  %3556 = vmatprep.mubr.msk.bf16.mxu1 %vm3911_vm0, %v3910_v0 }
 0x850   :  { %3542 = vmatprep.subr.bf16.mxu1 %v3910_v0 }
 0x853   :  { %3543 = vmatpush3.bf16.msra.mxu1 %v3751_v6 }
 0x854   :  { %3544 = vmatprep.subr.bf16.mxu1 %v3910_v0 }
 0x856   :  { %v3288_v60 = vpop.f32.mrf.mxu0 }
 0x857   :  { %3545 = vmatpush3.bf16.msra.mxu1 %v3752_v10 }
 0x858   :  { %v3289_v7 = vpop.f32.mrf.mxu0  ;;  %3546 = vmatprep.subr.bf16.mxu1 %v3910_v0 }
 0x859   :  { %v3290_v61 = vadd.f32 %v3289_v7, %v3288_v60 }
 0x85a   :  { %v3291_v8 = vpop.f32.mrf.mxu0 }
 0x85b   :  { %3547 = vmatpush3.bf16.msra.mxu1 %v3753_v11  ;;  %v2717_v41 = vadd.f32 %v3290_v61, %v3044_v40 }
 0x85c   :  { %v3292_v9 = vpop.f32.mrf.mxu0  ;;  %3548 = vmatprep.subr.bf16.mxu1 %v3910_v0 }
 0x85f   :  { %3549 = vmatpush3.bf16.msra.mxu1 %v3754_v12 }
 0x860   :  { %3550 = vmatprep.subr.bf16.mxu1 %v3910_v0 }
 0x863   :  { %3551 = vmatpush3.bf16.msra.mxu1 %v3755_v13 }
 0x864   :  { %3552 = vmatprep.subr.bf16.mxu1 %v3910_v0 }
 0x867   :  { %3553 = vmatpush3.bf16.msra.mxu1 %v3756_v14 }
 0x868   :  { %3554 = vmatprep.subr.bf16.mxu1 %v3910_v0 }
 0x86b   :  { %3555 = vmatpush3.bf16.msra.mxu1 %v3757_v15 }
 0x90e   :  { %v2450_v25 = vpop.f32.mrf.mxu1 }
 0x90f   :  { %v2451_v27 = vadd.f32 %v3035_v24, %v2450_v25 }
 0x910   :  { %v3538_v26 = vpop.f32.mrf.mxu1 }
 0x911   :  { %v2457_v31 = vmax.f32 %v2451_v27, 0.0 }
 0x912   :  { %v2453_v28 = vpop.f32.mrf.mxu1 }
 0x913   :  { %v2454_v29 = vadd.f32 %v3035_v24, %v2453_v28 }
 0x914   :  { %v3539_v30 = vpop.f32.mrf.mxu1 }
 0x915   :  { %v2458_v32 = vmax.f32 %v2454_v29, 0.0 }
 0x917   :  { %v2473_v33 = vadd.f32 %v2458_v32, %v2457_v31 }
 0x919   :  { %v2474_v34 = vrot.slane %v2473_v33, 4 }
 0x91b   :  { %v2475_v35 = vadd.f32 %v2474_v34, %v2473_v33 }
 0x91d   :  { %v2476_v17 = vrot.slane %v2475_v35, 2 }
 0x91f   :  { %v2477_v18 = vadd.f32 %v2476_v17, %v2475_v35 }
 0x921   :  { %v2478_v36 = vrot.slane %v2477_v18, 1 }
 0x923   :  { %v2479_v37 = vadd.f32 %v2478_v36, %v2477_v18 }
 0x925   :  { %v2482_v0 = vpack.c.bf16 %v2479_v37, %v2479_v37 }
 0x927   :  { %3557 = vmatmul.mubr.bf16.vlgmr.msra.gmra.mxu1 %v2482_v0 }
 0x9e7   :  { %v2756_v43 = vpop.f32.mrf.mxu1 }
 0x9e8   :  { %v2757_v44 = vadd.f32 %v2756_v43, %v2717_v41 }
 0x9e9   :  { %v3558_v45 = vpop.f32.mrf.mxu1 }
 0x9ea   :  { %v2762_v46 = vpack.c.bf16 %v2757_v44, %v2757_v44 }
 0x9eb   :  { %v2759_v47 = vpop.f32.mrf.mxu1 }
 0x9ec   :  { %3577 = vmatmul.mubr.bf16.vlgmr.msra.gmra.mxu0 %v2762_v46 }
 0x9ed   :  { %v3559_v48 = vpop.f32.mrf.mxu1 }
 0xaac   :  { %v2868_v50 = vpop.f32.mrf.mxu0 }
 0xaad   :  { %v2869_v51 = vadd.f32 %v3069_v49, %v2868_v50 }
 0xaae   :  { %v3578_v52 = vpop.f32.mrf.mxu0 }
 0xaaf   :  { %2874 = vst [vmem:[%s4269_s14] sm:$0xff] %v2869_v51 }
 0xab0   :  { %v2871_v53 = vpop.f32.mrf.mxu0 }
 0xab2   :  { %v3579_v54 = vpop.f32.mrf.mxu0 }
 0xab3   :  { %2879 = vsyncpa [#allocation3], 1 }
 0xab4   :  { %2880 = vsyncpa [#allocation5], 1 }
 0xab5   :  { %2881 = vsyncpa [#allocation8], 1 }
 0xab6   :  { %2882 = vsyncpa [#allocation11], 1 }

</bundles_post_ra>
